<compile_context>
chip_gen: v6e
topology: v6e:2x2x1
jax: 0.10.0
libtpu: 0.0.40
codegen_flags: <defaults>
</compile_context>

<pallas_src>
import math

import jax
import jax.numpy as jnp
from jax.experimental import pallas as pl
from jax.experimental.pallas import tpu as pltpu


# ----------------------------- Pallas kernel -------------------------------

def _glu_kernel(x_ref, wuv_ref, buv_ref, wo_ref, bo_ref, o_ref):
    """Fused GLU for one row-tile.

    x_ref:   [tm, F]      bf16 input rows
    wuv_ref: [F, 2*n*F]   bf16 concat(w_u, w_v) — single MXU GEMM for both gates
    buv_ref: [1, 2*n*F]   f32 concat(b_u, b_v)
    wo_ref:  [n*F, out]   bf16 output projection weight
    bo_ref:  [1, out]     f32 output projection bias
    o_ref:   [tm, out]    output rows (final lane-dense layout)
    """
    h = wuv_ref.shape[1] // 2

    # GEMM 1: bf16 operands, f32 accumulation on the MXU; f32 bias add.
    gates = jnp.dot(x_ref[...], wuv_ref[...],
                    preferred_element_type=jnp.float32) + buv_ref[...]

    # Lane-aligned gate split (h is a multiple of 128).
    u = gates[:, :h]
    v = gates[:, h:]

    # sigmoid(u) = 1 / (1 + exp(-u)): exp and the approximate reciprocal both
    # run on the EUP slot, staying hidden under the MXU work.
    uv = (pl.reciprocal(1.0 + jnp.exp(-u), approx=True) * v).astype(wo_ref.dtype)

    # NOTE: for very large n*F, chunk the gate along lanes and accumulate this
    # second GEMM into a [tm, out] f32 VMEM scratch to bound live temporaries.
    o_ref[...] = (jnp.dot(uv, wo_ref[...],
                          preferred_element_type=jnp.float32)
                  + bo_ref[...]).astype(o_ref.dtype)


# ------------------------------- wrapper ------------------------------------

def glu_forward(src, params, *, tm=256):
    """src: [..., in_feature] (bf16 preferred). Returns [..., out_feature] in src dtype."""
    orig_shape = src.shape
    f_in = orig_shape[-1]
    out_dtype = src.dtype

    # Keep the native dtype — no wrapper-side f32 materialization of x.
    x = src.reshape(-1, f_in)
    m = x.shape[0]

    w_uv, b_uv = params["w_uv"], params["b_uv"]   # [F, 2nF] bf16, [1, 2nF] f32
    w_o, b_o = params["w_o"], params["b_o"]       # [nF, out] bf16, [1, out] f32
    h2 = w_uv.shape[1]
    nf = h2 // 2
    f_out = w_o.shape[1]

    # ---- row tiling ---------------------------------------------------------
    m8 = ((m + 7) // 8) * 8                  # sublane-rounded row count
    tm = max(8, (tm // 8) * 8)               # tile must be a multiple of 8
    if m8 >= 16:
        # Guarantee >= 2 grid steps so the "parallel" axis can shard across
        # both TensorCores on v7x (and pipelines input/output DMA).
        tm = min(tm, max(8, (m8 // 2) // 8 * 8))
    tm = min(tm, m8)
    m_pad = ((m + tm - 1) // tm) * tm
    if m_pad != m:
        x = jnp.pad(x, ((0, m_pad - m), (0, 0)))
    grid = (m_pad // tm,)

    # ---- advisory cost estimate --------------------------------------------
    in_bytes = (x.size * x.dtype.itemsize
                + w_uv.size * w_uv.dtype.itemsize + b_uv.size * b_uv.dtype.itemsize
                + w_o.size * w_o.dtype.itemsize + b_o.size * b_o.dtype.itemsize)
    out_bytes = m_pad * f_out * jnp.dtype(out_dtype).itemsize
    cost = pl.CostEstimate(
        flops=2 * m_pad * f_in * h2 + 2 * m_pad * nf * f_out,
        transcendentals=m_pad * nf,               # one exp per gate element
        bytes_accessed=in_bytes + out_bytes,
    )

    # ---- explicit VMEM budget (weights + double-buffered tiles + temporaries)
    weight_bytes = (w_uv.size * w_uv.dtype.itemsize + w_o.size * w_o.dtype.itemsize
                    + b_uv.size * b_uv.dtype.itemsize + b_o.size * b_o.dtype.itemsize)
    tile_bytes = 2 * tm * f_in * x.dtype.itemsize \
        + 2 * tm * f_out * jnp.dtype(out_dtype).itemsize
    temp_bytes = tm * (2 * h2 + nf + f_out) * 4   # f32 gates / uv / out temporaries
    vmem_limit = int(min(64 * 1024 * 1024,
                         max(16 * 1024 * 1024,
                             2 * (2 * weight_bytes + tile_bytes + temp_bytes))))

    def run(buffered_weights):
        # Resident weights/biases do not need double-buffering; Buffered(1)
        # halves their VMEM footprint (important on v7x's 64 MiB VMEM).
        if buffered_weights and hasattr(pl, "Buffered"):
            w_mode = dict(pipeline_mode=pl.Buffered(1))
        else:
            w_mode = {}
        out = pl.pallas_call(
            _glu_kernel,
            out_shape=jax.ShapeDtypeStruct((m_pad, f_out), out_dtype),
            grid_spec=pltpu.PrefetchScalarGridSpec(
                num_scalar_prefetch=0,
                grid=grid,
                in_specs=[
                    pl.BlockSpec((tm, f_in), lambda i: (i, 0)),              # x rows
                    pl.BlockSpec((f_in, h2), lambda i: (0, 0), **w_mode),    # w_uv
                    pl.BlockSpec((1, h2),    lambda i: (0, 0), **w_mode),    # b_uv
                    pl.BlockSpec((nf, f_out), lambda i: (0, 0), **w_mode),   # w_o
                    pl.BlockSpec((1, f_out), lambda i: (0, 0), **w_mode),    # b_o
                ],
                out_specs=pl.BlockSpec((tm, f_out), lambda i: (i, 0)),
            ),
            compiler_params=pltpu.CompilerParams(
                dimension_semantics=("parallel",),   # independent row tiles
                vmem_limit_bytes=vmem_limit,
            ),
            cost_estimate=cost,
        )(x, w_uv, b_uv, w_o, b_o)
        return jax.block_until_ready(out)

    try:
        out = run(buffered_weights=True)
    except Exception:
        # pipeline_mode=pl.Buffered(1) unsupported on this jax/backend:
        # fall back to default (double-buffered) weight residency.
        out = run(buffered_weights=False)

    return out[:m].reshape(orig_shape[:-1] + (f_out,))


# --------------------------- pure-JAX reference ------------------------------

def glu_reference(src, params):
    x = src.astype(jnp.float32)
    w_uv = params["w_uv"].astype(jnp.float32)
    w_o = params["w_o"].astype(jnp.float32)
    h = w_uv.shape[1] // 2
    gates = x @ w_uv + params["b_uv"][0]
    u, v = gates[..., :h], gates[..., h:]
    uv = jax.nn.sigmoid(u) * v
    return uv @ w_o + params["b_o"][0]


# ------------------------------- parameters ----------------------------------

def make_params(key, in_feature, out_feature, n=1, dtype=jnp.bfloat16):
    """nn.Linear-style init: weight/bias ~ U(-1/sqrt(fan_in), 1/sqrt(fan_in)).

    Weights are stored transposed ([in, out]) and in bf16 (MXU-native); the u-
    and v-projections are fused column-wise into a single [F, 2*n*F] matrix.
    Biases stay f32 and are added to the f32 accumulators inside the kernel.
    """
    nf = n * in_feature
    ku = 1.0 / math.sqrt(in_feature)
    ko = 1.0 / math.sqrt(nf)
    keys = jax.random.split(key, 6)
    uni = lambda kk, shape, k: jax.random.uniform(kk, shape, jnp.float32, -k, k)

    w_u = uni(keys[0], (nf, in_feature), ku).T          # [F, nF]
    b_u = uni(keys[1], (nf,), ku)
    w_v = uni(keys[2], (nf, in_feature), ku).T          # [F, nF]
    b_v = uni(keys[3], (nf,), ku)
    w_o = uni(keys[4], (out_feature, nf), ko).T         # [nF, out]
    b_o = uni(keys[5], (out_feature,), ko)

    return dict(
        w_uv=jnp.concatenate([w_u, w_v], axis=1).astype(dtype),   # [F, 2nF] bf16
        b_uv=jnp.concatenate([b_u, b_v]).reshape(1, 2 * nf),      # [1, 2nF] f32
        w_o=w_o.astype(dtype),                                    # [nF, out] bf16
        b_o=b_o.reshape(1, out_feature),                          # [1, out]  f32
    )


# ---------------------------------- main --------------------------------------

if __name__ == "__main__":
    B, S, F_IN, N, F_OUT = 4, 16, 128, 2, 128   # n*F = 256 → lane-aligned gate split
    root = jax.random.PRNGKey(0)
    k_x, k_p = jax.random.split(root)

    # bf16 activations: no wrapper cast needed, bf16 operands feed the MXU.
    src = jax.random.normal(k_x, (B, S, F_IN), jnp.float32).astype(jnp.bfloat16)
    params = make_params(k_p, F_IN, F_OUT, n=N)

    out = jax.block_until_ready(glu_forward(src, params))     # [B, S, F_OUT] bf16
    ref = jax.block_until_ready(glu_reference(src, params))   # f32 reference

    assert out.shape == (B, S, F_OUT)
    err = float(jnp.max(jnp.abs(out.astype(jnp.float32) - ref)))
    # bf16 operands + f32 accumulation + approx reciprocal → loosened tolerance.
    assert err < 5e-2, f"max abs err = {err}"

    print("KERNEL_OK")
</pallas_src>

<mosaic_0001>
module attributes {stable_mosaic.version = 11 : i64} {
  func.func @_glu_kernel(%arg0: i32, %arg1: memref<32x128xbf16, #tpu.memory_space<vmem>>, %arg2: memref<128x512xbf16, #tpu.memory_space<vmem>>, %arg3: memref<1x512xf32, #tpu.memory_space<vmem>>, %arg4: memref<256x128xbf16, #tpu.memory_space<vmem>>, %arg5: memref<1x128xf32, #tpu.memory_space<vmem>>, %arg6: memref<32x128xbf16, #tpu.memory_space<vmem>>) attributes {dimension_semantics = [#tpu.dimension_semantics<parallel>], iteration_bounds = array<i64: 2>, scalar_prefetch = 0 : i64, scratch_operands = 0 : i64, tpu.core_type = #tpu.core_type<tc>, window_params = [{transform_indices = @transform_0, window_bounds = array<i64: 32, 128>}, {pipeline_mode = #tpu.pipeline_mode<synchronous>, transform_indices = @transform_1, window_bounds = array<i64: 128, 512>}, {pipeline_mode = #tpu.pipeline_mode<synchronous>, transform_indices = @transform_2, window_bounds = array<i64: 1, 512>}, {pipeline_mode = #tpu.pipeline_mode<synchronous>, transform_indices = @transform_3, window_bounds = array<i64: 256, 128>}, {pipeline_mode = #tpu.pipeline_mode<synchronous>, transform_indices = @transform_4, window_bounds = array<i64: 1, 128>}, {transform_indices = @transform_5, window_bounds = array<i64: 32, 128>}]} {
    %c0 = arith.constant 0 : index
    %c0_0 = arith.constant 0 : index
    %0 = vector.load %arg1[%c0, %c0_0] : memref<32x128xbf16, #tpu.memory_space<vmem>>, vector<32x128xbf16>
    %c0_1 = arith.constant 0 : index
    %c0_2 = arith.constant 0 : index
    %1 = vector.load %arg2[%c0_1, %c0_2] : memref<128x512xbf16, #tpu.memory_space<vmem>>, vector<128x512xbf16>
    %cst = arith.constant dense<0.000000e+00> : vector<32x512xf32>
    %2 = tpu.matmul %0, %1, %cst {dimension_numbers = #tpu.dot_dimension_numbers<[1], [0], [0], [1], [0, 0, 1, 1], [], []>} : vector<32x128xbf16>, vector<128x512xbf16>, vector<32x512xf32> -> vector<32x512xf32>
    %c0_3 = arith.constant 0 : index
    %c0_4 = arith.constant 0 : index
    %3 = vector.load %arg3[%c0_3, %c0_4] : memref<1x512xf32, #tpu.memory_space<vmem>>, vector<1x512xf32>
    %4 = vector.broadcast %3 : vector<1x512xf32> to vector<32x512xf32>
    %5 = arith.addf %2, %4 : vector<32x512xf32>
    %6 = vector.extract_strided_slice %5 {offsets = [0, 0], sizes = [32, 256], strides = [1, 1]} : vector<32x512xf32> to vector<32x256xf32>
    %7 = vector.extract_strided_slice %5 {offsets = [0, 256], sizes = [32, 256], strides = [1, 1]} : vector<32x512xf32> to vector<32x256xf32>
    %cst_5 = arith.constant 0.000000e+00 : f32
    %8 = vector.broadcast %cst_5 : f32 to vector<32x256xf32>
    %9 = arith.subf %8, %6 : vector<32x256xf32>
    %10 = math.exp %9 : vector<32x256xf32>
    %cst_6 = arith.constant 1.000000e+00 : f32
    %11 = vector.broadcast %cst_6 : f32 to vector<32x256xf32>
    %12 = arith.addf %11, %10 : vector<32x256xf32>
    %13 = tpu.reciprocal %12 {approx = true} : vector<32x256xf32> -> vector<32x256xf32>
    %14 = arith.mulf %13, %7 : vector<32x256xf32>
    %15 = arith.truncf %14 : vector<32x256xf32> to vector<32x256xbf16>
    %c0_7 = arith.constant 0 : index
    %c0_8 = arith.constant 0 : index
    %16 = vector.load %arg4[%c0_7, %c0_8] : memref<256x128xbf16, #tpu.memory_space<vmem>>, vector<256x128xbf16>
    %cst_9 = arith.constant dense<0.000000e+00> : vector<32x128xf32>
    %17 = tpu.matmul %15, %16, %cst_9 {dimension_numbers = #tpu.dot_dimension_numbers<[1], [0], [0], [1], [0, 0, 1, 1], [], []>} : vector<32x256xbf16>, vector<256x128xbf16>, vector<32x128xf32> -> vector<32x128xf32>
    %c0_10 = arith.constant 0 : index
    %c0_11 = arith.constant 0 : index
    %18 = vector.load %arg5[%c0_10, %c0_11] : memref<1x128xf32, #tpu.memory_space<vmem>>, vector<1x128xf32>
    %19 = vector.broadcast %18 : vector<1x128xf32> to vector<32x128xf32>
    %20 = arith.addf %17, %19 : vector<32x128xf32>
    %21 = arith.truncf %20 : vector<32x128xf32> to vector<32x128xbf16>
    %c0_12 = arith.constant 0 : index
    %c0_13 = arith.constant 0 : index
    %22 = vector.load %arg6[%c0_12, %c0_13] : memref<32x128xbf16, #tpu.memory_space<vmem>>, vector<32x128xbf16>
    tpu.vector_store %arg6[%c0_12, %c0_13], %21 {strides = array<i32>} : memref<32x128xbf16, #tpu.memory_space<vmem>>, vector<32x128xbf16>,
    return
  }
  func.func @transform_0(%arg0: i32) -> (i32, i32) {
    %c0_i32 = arith.constant 0 : i32
    %c0_i32_0 = arith.constant 0 : i32
    return %arg0, %c0_i32 : i32, i32
  }
  func.func @transform_1(%arg0: i32) -> (i32, i32) {
    %c0_i32 = arith.constant 0 : i32
    %c0_i32_0 = arith.constant 0 : i32
    %c0_i32_1 = arith.constant 0 : i32
    return %c0_i32, %c0_i32_0 : i32, i32
  }
  func.func @transform_2(%arg0: i32) -> (i32, i32) {
    %c0_i32 = arith.constant 0 : i32
    %c0_i32_0 = arith.constant 0 : i32
    %c0_i32_1 = arith.constant 0 : i32
    return %c0_i32, %c0_i32_0 : i32, i32
  }
  func.func @transform_3(%arg0: i32) -> (i32, i32) {
    %c0_i32 = arith.constant 0 : i32
    %c0_i32_0 = arith.constant 0 : i32
    %c0_i32_1 = arith.constant 0 : i32
    return %c0_i32, %c0_i32_0 : i32, i32
  }
  func.func @transform_4(%arg0: i32) -> (i32, i32) {
    %c0_i32 = arith.constant 0 : i32
    %c0_i32_0 = arith.constant 0 : i32
    %c0_i32_1 = arith.constant 0 : i32
    return %c0_i32, %c0_i32_0 : i32, i32
  }
  func.func @transform_5(%arg0: i32) -> (i32, i32) {
    %c0_i32 = arith.constant 0 : i32
    %c0_i32_0 = arith.constant 0 : i32
    return %arg0, %c0_i32 : i32, i32
  }
}

module attributes {stable_mosaic.version = 11 : i64} {
  func.func @_glu_kernel(%arg0: i32, %arg1: memref<32x128xbf16, #tpu.memory_space<vmem>>, %arg2: memref<128x512xbf16, #tpu.memory_space<vmem>>, %arg3: memref<1x512xf32, #tpu.memory_space<vmem>>, %arg4: memref<256x128xbf16, #tpu.memory_space<vmem>>, %arg5: memref<1x128xf32, #tpu.memory_space<vmem>>, %arg6: memref<32x128xbf16, #tpu.memory_space<vmem>>) attributes {dimension_semantics = [#tpu.dimension_semantics<parallel>], iteration_bounds = array<i64: 2>, scalar_prefetch = 0 : i64, scratch_operands = 0 : i64, tpu.core_type = #tpu.core_type<tc>, window_params = [{transform_indices = @transform_0, window_bounds = array<i64: 32, 128>}, {pipeline_mode = #tpu.pipeline_mode<synchronous>, transform_indices = @transform_1, window_bounds = array<i64: 128, 512>}, {pipeline_mode = #tpu.pipeline_mode<synchronous>, transform_indices = @transform_2, window_bounds = array<i64: 1, 512>}, {pipeline_mode = #tpu.pipeline_mode<synchronous>, transform_indices = @transform_3, window_bounds = array<i64: 256, 128>}, {pipeline_mode = #tpu.pipeline_mode<synchronous>, transform_indices = @transform_4, window_bounds = array<i64: 1, 128>}, {transform_indices = @transform_5, window_bounds = array<i64: 32, 128>}]} {
    %c0 = arith.constant 0 : index
    %c0_0 = arith.constant 0 : index
    %0 = vector.load %arg1[%c0, %c0_0] : memref<32x128xbf16, #tpu.memory_space<vmem>>, vector<32x128xbf16>
    %c0_1 = arith.constant 0 : index
    %c0_2 = arith.constant 0 : index
    %1 = vector.load %arg2[%c0_1, %c0_2] : memref<128x512xbf16, #tpu.memory_space<vmem>>, vector<128x512xbf16>
    %cst = arith.constant dense<0.000000e+00> : vector<32x512xf32>
    %2 = tpu.matmul %0, %1, %cst {dimension_numbers = #tpu.dot_dimension_numbers<[1], [0], [0], [1], [0, 0, 1, 1], [], []>} : vector<32x128xbf16>, vector<128x512xbf16>, vector<32x512xf32> -> vector<32x512xf32>
    %c0_3 = arith.constant 0 : index
    %c0_4 = arith.constant 0 : index
    %3 = vector.load %arg3[%c0_3, %c0_4] : memref<1x512xf32, #tpu.memory_space<vmem>>, vector<1x512xf32>
    %4 = vector.broadcast %3 : vector<1x512xf32> to vector<32x512xf32>
    %5 = arith.addf %2, %4 : vector<32x512xf32>
    %6 = vector.extract_strided_slice %5 {offsets = [0, 0], sizes = [32, 256], strides = [1, 1]} : vector<32x512xf32> to vector<32x256xf32>
    %7 = vector.extract_strided_slice %5 {offsets = [0, 256], sizes = [32, 256], strides = [1, 1]} : vector<32x512xf32> to vector<32x256xf32>
    %cst_5 = arith.constant 0.000000e+00 : f32
    %8 = vector.broadcast %cst_5 : f32 to vector<32x256xf32>
    %9 = arith.subf %8, %6 : vector<32x256xf32>
    %10 = math.exp %9 : vector<32x256xf32>
    %cst_6 = arith.constant 1.000000e+00 : f32
    %11 = vector.broadcast %cst_6 : f32 to vector<32x256xf32>
    %12 = arith.addf %11, %10 : vector<32x256xf32>
    %13 = tpu.reciprocal %12 {approx = true} : vector<32x256xf32> -> vector<32x256xf32>
    %14 = arith.mulf %13, %7 : vector<32x256xf32>
    %15 = arith.truncf %14 : vector<32x256xf32> to vector<32x256xbf16>
    %c0_7 = arith.constant 0 : index
    %c0_8 = arith.constant 0 : index
    %16 = vector.load %arg4[%c0_7, %c0_8] : memref<256x128xbf16, #tpu.memory_space<vmem>>, vector<256x128xbf16>
    %cst_9 = arith.constant dense<0.000000e+00> : vector<32x128xf32>
    %17 = tpu.matmul %15, %16, %cst_9 {dimension_numbers = #tpu.dot_dimension_numbers<[1], [0], [0], [1], [0, 0, 1, 1], [], []>} : vector<32x256xbf16>, vector<256x128xbf16>, vector<32x128xf32> -> vector<32x128xf32>
    %c0_10 = arith.constant 0 : index
    %c0_11 = arith.constant 0 : index
    %18 = vector.load %arg5[%c0_10, %c0_11] : memref<1x128xf32, #tpu.memory_space<vmem>>, vector<1x128xf32>
    %19 = vector.broadcast %18 : vector<1x128xf32> to vector<32x128xf32>
    %20 = arith.addf %17, %19 : vector<32x128xf32>
    %21 = arith.truncf %20 : vector<32x128xf32> to vector<32x128xbf16>
    %c0_12 = arith.constant 0 : index
    %c0_13 = arith.constant 0 : index
    %22 = vector.load %arg6[%c0_12, %c0_13] : memref<32x128xbf16, #tpu.memory_space<vmem>>, vector<32x128xbf16>
    tpu.vector_store %arg6[%c0_12, %c0_13], %21 {strides = array<i32>} : memref<32x128xbf16, #tpu.memory_space<vmem>>, vector<32x128xbf16>,
    return
  }
  func.func @transform_0(%arg0: i32) -> (i32, i32) {
    %c0_i32 = arith.constant 0 : i32
    %c0_i32_0 = arith.constant 0 : i32
    return %arg0, %c0_i32 : i32, i32
  }
  func.func @transform_1(%arg0: i32) -> (i32, i32) {
    %c0_i32 = arith.constant 0 : i32
    %c0_i32_0 = arith.constant 0 : i32
    %c0_i32_1 = arith.constant 0 : i32
    return %c0_i32, %c0_i32_0 : i32, i32
  }
  func.func @transform_2(%arg0: i32) -> (i32, i32) {
    %c0_i32 = arith.constant 0 : i32
    %c0_i32_0 = arith.constant 0 : i32
    %c0_i32_1 = arith.constant 0 : i32
    return %c0_i32, %c0_i32_0 : i32, i32
  }
  func.func @transform_3(%arg0: i32) -> (i32, i32) {
    %c0_i32 = arith.constant 0 : i32
    %c0_i32_0 = arith.constant 0 : i32
    %c0_i32_1 = arith.constant 0 : i32
    return %c0_i32, %c0_i32_0 : i32, i32
  }
  func.func @transform_4(%arg0: i32) -> (i32, i32) {
    %c0_i32 = arith.constant 0 : i32
    %c0_i32_0 = arith.constant 0 : i32
    %c0_i32_1 = arith.constant 0 : i32
    return %c0_i32, %c0_i32_0 : i32, i32
  }
  func.func @transform_5(%arg0: i32) -> (i32, i32) {
    %c0_i32 = arith.constant 0 : i32
    %c0_i32_0 = arith.constant 0 : i32
    return %arg0, %c0_i32 : i32, i32
  }
}

</mosaic_0001>

<bundles_post_ra>
// kernel: tpu_custom_call.1
= control target key start
LH: loop header
LB: loop body
LE: loop exit
PB: predicated region body
PF: predicated region fallthrough
CT: control target
= control target key end

     0   :  { %10 = vsyncpa [#allocation3], 0  ;;  %s1769_s0 = inlined_call_operand.hbm [shape: bf16[64,128], index: 0, kind: input, shape index: {}]   ;;  %s1770_s1 = inlined_call_operand.hbm [shape: bf16[128,512], index: 1, kind: input, shape index: {}]   ;;  %s1771_s2 = inlined_call_operand.hbm [shape: f32[1,512], index: 2, kind: input, shape index: {}]   ;;  %s1772_s3 = inlined_call_operand.hbm [shape: bf16[256,128], index: 3, kind: input, shape index: {}]   ;;  %s1773_s4 = inlined_call_operand.vmem [shape: f32[1,128], index: 4, kind: input, shape index: {}]   ;;  %s1774_s5 = inlined_call_operand.hbm [shape: bf16[64,128], index: 5, kind: output, shape index: {}]  }
   0x1   :  { %12 = vsyncpa [#allocation3 + $0x1], 0 }
   0x2   :  { %13 = vsyncpa [#allocation6], 0 }
   0x3   :  { %14 = vsyncpa [#allocation9], 0 }
   0x4   :  { %15 = vsyncpa [#allocation4], 0 }
   0x5   :  { %17 = vsyncpa [#allocation4 + $0x1], 0  ;;  %s1536_s18 = smov 0   ;;  %s1538_s19 = smov 0  }
   0x6   :  { %s1540_s20 = smov 0   ;;  %s1542_s21 = smov 0  }
   0x7 LB: > { %s1557_s22 = sadd.s32 4294967295, %s1492_s21   ;;  %s996_s23 = sadd.s32 4294967294, %s1492_s21   ;;  %s1492_s21 = sphi %s1542_s21, %s1800_s21   ;;  %s1488_s20 = sphi %s1540_s20, %s1799_s20   ;;  %s1484_s19 = sphi %s1538_s19, %s1798_s19   ;;  %s1480_s18 = sphi %s1536_s18, %s1797_s18  }
   0x8   : > { %p43_p0 = scmp.ne.s32.totalorder %s1484_s19, %s1480_s18  ;;  %p1775_p1 = scmp.eq.s32.totalorder %s1557_s22, 0 }
   0x9   : > { %p157_p3 = scmp.eq.s32.totalorder %s996_s23, 1  ;;  %p997_p5 = scmp.ge.s32.totalorder %s1492_s21, 1 }
   0xa   : > { %p1566_p4 = por %p1775_p1, %p43_p0  ;;  %p164_p7 = scmp.lt.s32.totalorder %s1492_s21, 3 }
   0xb   : > { %p1571_p6 = por %p157_p3, %p43_p0  ;;  %s1494_s27 = smov [#allocation5]  }
   0xc   : > { %s1780_s24 = scalar_select %p1566_p4, 1, 0 }
   0xd   : > { %s1781_s25 = scalar_select %p1571_p6, 1, 0 }
   0xe   : > { %p1576_p8 = pnand %p997_p5, %p164_p7  ;;  %s176_s28 = sshll.u32 %s1494_s27, 4  ;;  %s177_s28 = int_to_ptr.vmem [resolvable:$true] %s176_s28 }
   0xf   : > { %s1495_s30 = smov [#allocation7]   ;;  %s1496_s7 = smov [#allocation8]  }
  0x10   : > { %s1782_s26 = scalar_select %p1576_p8, 1, 0 }
  0x11   : > { %p1148_p9 = pneg %p1576_p8  ;;  %s190_s6 = sshll.u32 %s1495_s30, 4  ;;  %s191_s6 = int_to_ptr.vmem [resolvable:$true] %s190_s6 }
  0x12   : > { %s200_s8 = sshll.u32 %s1496_s7, 4  ;;  %s1325_s9 = scalar_lea.vmem %s177_s28, 4096  ;;  %s201_s8 = int_to_ptr.vmem [resolvable:$true] %s200_s8 }
  0x13   : > { %p1585_p11 = pnand %p1148_p9, %p1775_p1  ;;  %p1326_p13 = scmp.ne.s32.totalorder %s177_s28, %s1325_s9 }
  0x14   : > { %p1333_p5 = scmp.lt.s32.totalorder %s177_s28, %s177_s28  ;;  %p1334_p7 = scmp.lt.s32.totalorder %s1325_s9, %s1325_s9 }
  0x15   : > { %p1316_p12 = pneg %p1585_p11 }
  0x16   : > { %p1335_p9 = por %p1334_p7, %p1333_p5 }
  0x17   : > { %p1328_p0 = pnand %p1326_p13, %p1316_p12 }
  0x19   : > { %p1329_p3 = pneg %p1328_p0 }
  0x1b   : > { %p1336_p10 = pnand %p1335_p9, %p1329_p3 }
  0x1d   : > { %1339 = shalt.err (!%p1336_p10)
}
  0x1e   : > { %s1497_s10 = smov 256   ;;  %s1498_s11 = smov 16  }
  0x1f   : > { %1151 = dma.hbm_to_vmem [thread:$0]  (!%p1585_p11), %s1770_s1, 4096, %s177_s28, [#allocation6], %s1497_s10, %s1497_s10, %s1498_s11  }
  0x20   : > { %s1351_s14 = scalar_lea.vmem %s191_s6, 64  ;;  %p1359_p2 = scmp.lt.s32.totalorder %s191_s6, %s191_s6 }
  0x21   : > { %p1352_p1 = scmp.ne.s32.totalorder %s191_s6, %s1351_s14  ;;  %p1360_p6 = scmp.lt.s32.totalorder %s1351_s14, %s1351_s14 }
  0x23   : > { %p1354_p13 = pnand %p1352_p1, %p1316_p12  ;;  %p1361_p5 = por %p1360_p6, %p1359_p2 }
  0x25   : > { %p1355_p0 = pneg %p1354_p13 }
  0x27   : > { %p1362_p3 = pnand %p1361_p5, %p1355_p0 }
  0x29   : > { %1365 = shalt.err (!%p1362_p3)
}
  0x2a   : > { %1154 = dma.hbm_to_vmem [thread:$0]  (!%p1585_p11), %s1771_s2, 64, %s191_s6, [#allocation6]  }
  0x2b   : > { %s1377_s17 = scalar_lea.vmem %s201_s8, 2048  ;;  %p1385_p9 = scmp.lt.s32.totalorder %s201_s8, %s201_s8 }
  0x2c   : > { %p1378_p10 = scmp.ne.s32.totalorder %s201_s8, %s1377_s17  ;;  %p1386_p13 = scmp.lt.s32.totalorder %s1377_s17, %s1377_s17 }
  0x2e   : > { %p1380_p7 = pnand %p1378_p10, %p1316_p12  ;;  %p1387_p4 = por %p1386_p13, %p1385_p9 }
  0x30   : > { %p1381_p1 = pneg %p1380_p7 }
  0x32   : > { %p1388_p2 = pnand %p1387_p4, %p1381_p1 }
  0x34   : > { %1391 = shalt.err (!%p1388_p2)
}
  0x35   : > { %s1777_s23 = smov 64   ;;  %s1500_s27 = smov 4  }
  0x36   : > { %1157 = dma.hbm_to_vmem [thread:$0]  (!%p1585_p11), %s1772_s3, 2048, %s201_s8, [#allocation9], %s1777_s23, %s1777_s23, %s1500_s27  }
  0x37   : > { %s1619_s6 = sadd.s32 1, %s1492_s21   ;;  %s30_s9 = sadd.s32 1, %s1488_s20 }
  0x38   : > { %s27_s7 = ssub.s32 %s1492_s21, %s1619_s6  ;;  %p37_p6 = scmp.ne.s32.totalorder %s1488_s20, %s1484_s19 }
  0x39   : > { %p28_p4 = scmp.eq.s32.totalorder %s27_s7, 0  ;;  %p38_p12 = scmp.eq.s32.totalorder %s1492_s21, 0 }
  0x3a   : > { %p1169_p0 = scmp.lt.s32.totalorder %s1492_s21, 2  ;;  %p1784_p3 = scmp.eq.s32.totalorder %s1557_s22, 1 }
  0x3b   : > { %s1629_s10 = scalar_select %p28_p4, %s1488_s20, %s30_s9  }
  0x3c   : > { %p39_p5 = por %p38_p12, %p37_p6  ;;  %p1633_p10 = por %p1784_p3, %p37_p6 }
  0x3d   : > { %s217_s11 = sand.u32 1, %s1488_s20   ;;  %s1071_s12 = sshll.u32 %s1492_s21, 8 }
  0x3e   : > { %s1785_s29 = scalar_select %p1633_p10, 1, 0 }
  0x3f   : > { %s1002_s8 = sshll.u32 %s217_s11, 4  ;;  %s1642_s15 = scalar_lea.hbm %s1769_s0, %s1071_s12 }
  0x40   : > { %s221_s16 = scalar_lea.vmem [#allocation2], %s1002_s8  ;;  %p1644_p11 = pnand %p1169_p0, %p39_p5 }
  0x41   : > { %s228_s17 = sshll.u32 %s221_s16, 4  ;;  %s1650_s30 = scalar_lea.sflag [#allocation3], %s217_s11  ;;  %s1648_s17 = int_to_ptr.vmem [resolvable:$true] %s228_s17 }
  0x42   : > { %s1392_s7 = scalar_lea.hbm %s1642_s15, 256  ;;  %p1394_p1 = pneg %p1644_p11 }
  0x43   : > { %p1393_p7 = scmp.ne.s32.totalorder %s1642_s15, %s1392_s7  ;;  %s1397_s8 = scalar_lea.hbm %s1769_s0, 512 }
  0x44   : > { %p1398_p2 = scmp.lt.s32.totalorder %s1642_s15, %s1769_s0  ;;  %p1399_p4 = scmp.lt.s32.totalorder %s1397_s8, %s1392_s7 }
  0x45   : > { %p1395_p9 = pnand %p1394_p1, %p1393_p7 }
  0x46   : > { %p1400_p6 = por %p1399_p4, %p1398_p2 }
  0x47   : > { %p1396_p13 = pneg %p1395_p9 }
  0x49   : > { %p1401_p12 = pnand %p1400_p6, %p1396_p13 }
  0x4b   : > { %1404 = shalt.err (!%p1401_p12)
}
  0x4c   : > { %s1405_s11 = scalar_lea.vmem %s1648_s17, 256  ;;  %s1501_s16 = smov [#allocation2]  }
  0x4d   : > { %p1406_p0 = scmp.ne.s32.totalorder %s1648_s17, %s1405_s11  ;;  %s1410_s23 = sshll.u32 %s1501_s16, 4  ;;  %s1411_s23 = int_to_ptr.vmem [resolvable:$false] %s1410_s23 }
  0x4e   : > { %s1412_s9 = scalar_lea.vmem %s1411_s23, 512  ;;  %p1413_p7 = scmp.lt.s32.totalorder %s1648_s17, %s1411_s23 }
  0x4f   : > { %p1408_p5 = pnand %p1406_p0, %p1394_p1  ;;  %p1414_p9 = scmp.lt.s32.totalorder %s1412_s9, %s1405_s11 }
  0x51   : > { %p1409_p3 = pneg %p1408_p5  ;;  %p1415_p10 = por %p1414_p9, %p1413_p7 }
  0x53   : > { %p1416_p8 = pnand %p1415_p10, %p1409_p3 }
  0x55   : > { %1419 = shalt.err (!%p1416_p8)
}
  0x56   : > { %s1787_s7 = smov 64   ;;  %p1788_p1 = scmp.ne.s32.totalorder %s1782_s26, 0 }
  0x57   : > { %1161 = dma.hbm_to_vmem [thread:$0]  (!%p1644_p11), %s1642_s15, 256, %s1648_s17, %s1650_s30, %s1787_s7, %s1787_s7, %s1500_s27  }
  0x58   : > { %240 = sbr.rel (%p1788_p1) target bundleno = 601 (0x259), region = 40  ;;  %s1677_s12 = sand.u32 (!%p1788_p1), 1, %s1484_s19  }
  0x59   : > { %s1006_s23 = sshll.u32 (!%p1788_p1), %s1677_s12, 4  ;;  %s243_s8 = scalar_lea.sflag (!%p1788_p1), [#allocation3], %s1677_s12 }
  0x5a   : > { %s1683_s28 = scalar_lea.vmem (!%p1788_p1), [#allocation2], %s1006_s23  ;;  %p1789_p8 = scmp.ne.s32.totalorder (!%p1788_p1), %s1780_s24, 0 }
  0x5d   : > { %1463 = dma.done.wait (%p1789_p8), %s243_s8, 256  }
  0x5e   : > { %1465 = vsyncadd (%p1789_p8), %s243_s8, 4294967040  ;;  %p1790_p10 = scmp.eq.s32.totalorder %s1557_s22, 0 }
  0x60   : > { %1467 = dma.done.wait (%p1790_p10), [#allocation6], 4160   ;;  %p1791_p11 = pmov %p1790_p10 }
  0x61   : > { %p1792_p13 = pmov %p1790_p10 }
  0x62   : > { %1469 = vsyncadd (%p1791_p11), [#allocation6], 4294963136 }
  0x63   : > { %1471 = dma.done.wait (%p1792_p13), [#allocation9], 2048   ;;  %p1793_p2 = pmov %p1790_p10 }
  0x64   : > { %v1502_v0 = vmov 0   ;;  %v1216_v1 = vld [vmem:[#allocation5 + $0xe4] ss:$16 sps:$4 sm:$0xff]   ;;  %v1218_v2 = vld [vmem:[#allocation5 + $0xe0] ss:$16 sps:$4 sm:$0xff]   ;;  %v1250_v33 = vld [vmem:[%s1683_s28 + $0x8] sm:$0xff]   ;;  %v326_v51 = vlaneseq }
  0x65   : > { %1473 = vsyncadd (%p1793_p2), [#allocation9], 4294965248  ;;  %550 = vmatprep.mubr.bf16.mxu0 %v1502_v0  ;;  %603 = vmatprep.mubr.bf16.mxu1 %v1502_v0  ;;  %v1219_v3 = vld [vmem:[#allocation5 + $0xc4] ss:$16 sps:$4 sm:$0xff]   ;;  %v1221_v4 = vld [vmem:[#allocation5 + $0xc0] ss:$16 sps:$4 sm:$0xff]  }
  0x66   : > { %518 = vmatprep.subr.bf16.mxu0 %v1216_v1  ;;  %v1222_v5 = vld [vmem:[#allocation5 + $0xa4] ss:$16 sps:$4 sm:$0xff]   ;;  %v1224_v6 = vld [vmem:[#allocation5 + $0xa0] ss:$16 sps:$4 sm:$0xff]   ;;  %v1239_v9 = vld [vmem:[#allocation5 + $0xec] ss:$16 sps:$4 sm:$0xff]  }
  0x67   : > { %519 = vmatpush1.bf16.msra.mxu0 %v1218_v2  ;;  %v1225_v7 = vld [vmem:[#allocation5 + $0x84] ss:$16 sps:$4 sm:$0xff]   ;;  %v1227_v8 = vld [vmem:[#allocation5 + $0x80] ss:$16 sps:$4 sm:$0xff]   ;;  %v1242_v10 = vld [vmem:[#allocation5 + $0xe8] ss:$16 sps:$4 sm:$0xff]   ;;  %571 = vmatprep.subr.bf16.mxu1 %v1239_v9 }
  0x68   : > { %520 = vmatprep.subr.bf16.mxu0 %v1219_v3  ;;  %v1228_v11 = vld [vmem:[#allocation5 + $0x64] ss:$16 sps:$4 sm:$0xff]   ;;  %v1244_v12 = vld [vmem:[#allocation5 + $0xcc] ss:$16 sps:$4 sm:$0xff]   ;;  %572 = vmatpush1.bf16.msra.mxu1 %v1242_v10  ;;  %v1246_v13 = vld [vmem:[#allocation5 + $0xc8] ss:$16 sps:$4 sm:$0xff]  }
  0x69   : > { %v1230_v14 = vld [vmem:[#allocation5 + $0x60] ss:$16 sps:$4 sm:$0xff]   ;;  %573 = vmatprep.subr.bf16.mxu1 %v1244_v12  ;;  %v1247_v15 = vld [vmem:[#allocation5 + $0xac] ss:$16 sps:$4 sm:$0xff]   ;;  %v1231_v16 = vld [vmem:[#allocation5 + $0x44] ss:$16 sps:$4 sm:$0xff]  }
  0x6a   : > { %v1233_v17 = vld [vmem:[#allocation5 + $0x40] ss:$16 sps:$4 sm:$0xff]   ;;  %v1249_v18 = vld [vmem:[#allocation5 + $0xa8] ss:$16 sps:$4 sm:$0xff]   ;;  %v1251_v19 = vld [vmem:[#allocation5 + $0x8c] ss:$16 sps:$4 sm:$0xff]  }
  0x6b   : > { %521 = vmatpush1.bf16.msra.mxu0 %v1221_v4  ;;  %v1234_v20 = vld [vmem:[#allocation5 + $0x24] ss:$16 sps:$4 sm:$0xff]   ;;  %v1236_v21 = vld [vmem:[#allocation5 + $0x20] ss:$16 sps:$4 sm:$0xff]   ;;  %v1253_v22 = vld [vmem:[#allocation5 + $0x88] ss:$16 sps:$4 sm:$0xff]  }
  0x6c   : > { %522 = vmatprep.subr.bf16.mxu0 %v1222_v5  ;;  %574 = vmatpush1.bf16.msra.mxu1 %v1246_v13  ;;  %v1237_v23 = vld [vmem:[#allocation5 + $0x4] ss:$16 sps:$4 sm:$0xff]   ;;  %v1254_v24 = vld [vmem:[#allocation5 + $0x6c] ss:$16 sps:$4 sm:$0xff]   ;;  %v1256_v25 = vld [vmem:[#allocation5 + $0x68] ss:$16 sps:$4 sm:$0xff]  }
  0x6d   : > { %575 = vmatprep.subr.bf16.mxu1 %v1247_v15  ;;  %v1241_v26 = vld [vmem:[#allocation5] ss:$16 sps:$4 sm:$0xff]   ;;  %v1257_v27 = vld [vmem:[#allocation5 + $0x4c] ss:$16 sps:$4 sm:$0xff]   ;;  %v1259_v29 = vld [vmem:[#allocation5 + $0x48] ss:$16 sps:$4 sm:$0xff]  }
  0x6e   : > { %v1243_v28 = vld [vmem:[%s1683_s28] sm:$0xff]   ;;  %v1260_v30 = vld [vmem:[#allocation5 + $0x2c] ss:$16 sps:$4 sm:$0xff]   ;;  %v1262_v31 = vld [vmem:[#allocation5 + $0x28] ss:$16 sps:$4 sm:$0xff]   ;;  %v1703_v52 = vshrl.u32 %v326_v51, 7 }
  0x6f   : > { %523 = vmatpush1.bf16.msra.mxu0 %v1224_v6  ;;  %v1263_v32 = vld [vmem:[#allocation5 + $0xc] ss:$16 sps:$4 sm:$0xff]   ;;  %v1265_v34 = vld [vmem:[#allocation5 + $0x8] ss:$16 sps:$4 sm:$0xff]   ;;  %v1706_v54 = vld [vmem:[#allocation7] sm:$0xf] }
  0x70   : > { %524 = vmatprep.subr.bf16.mxu0 %v1225_v7  ;;  %576 = vmatpush1.bf16.msra.mxu1 %v1249_v18  ;;  %v1266_v35 = vld [vmem:[#allocation8 + $0x78] sm:$0xff]   ;;  %v1268_v37 = vld [vmem:[#allocation8 + $0x70] sm:$0xff]   ;;  %v1270_v39 = vld [vmem:[#allocation8 + $0x68] sm:$0xff]   ;;  %v328_v53 = vsub.s32 0, %v1703_v52  ;;  %v332_v55 = vsub.s32 1, %v1703_v52  ;;  %s284_s27 = scalar_lea.vmem [#allocation10], %s1006_s23 }
  0x71   : > { %577 = vmatprep.subr.bf16.mxu1 %v1251_v19  ;;  %v1267_v36 = vld [vmem:[#allocation8 + $0x38] sm:$0xff]   ;;  %v1269_v38 = vld [vmem:[#allocation8 + $0x30] sm:$0xff]   ;;  %v1271_v40 = vld [vmem:[#allocation8 + $0x28] sm:$0xff]   ;;  %s894_s15 = sshll.u32 %s284_s27, 4  ;;  %s1076_s17 = sshll.u32 %s1557_s22, 8  ;;  %s1721_s15 = int_to_ptr.vmem [resolvable:$true] %s894_s15 }
  0x72   : > { %v1272_v41 = vld [vmem:[#allocation8 + $0x60] sm:$0xff]   ;;  %v1274_v43 = vld [vmem:[#allocation8 + $0x58] sm:$0xff]   ;;  %v1276_v45 = vld [vmem:[#allocation8 + $0x50] sm:$0xff]   ;;  %v329_v56 = vrot.slane %v1706_v54, %v328_v53  ;;  %v333_v57 = vrot.slane %v1706_v54, %v332_v55  ;;  %s1726_s14 = scalar_lea.hbm %s1774_s5, %s1076_s17  ;;  %s881_s11 = scalar_lea.sflag [#allocation4], %s1677_s12 }
  0x73   : > { %525 = vmatpush1.bf16.msra.mxu0 %v1227_v8  ;;  %v1273_v42 = vld [vmem:[#allocation8 + $0x20] sm:$0xff]   ;;  %v1275_v44 = vld [vmem:[#allocation8 + $0x18] sm:$0xff]   ;;  %v1277_v46 = vld [vmem:[#allocation8 + $0x10] sm:$0xff]   ;;  %s1420_s16 = scalar_lea.vmem %s1721_s15, 256  ;;  %p1794_p6 = scmp.ne.s32.totalorder %s1785_s29, 0 }
  0x74   : > { %526 = vmatprep.subr.bf16.mxu0 %v1228_v11  ;;  %578 = vmatpush1.bf16.msra.mxu1 %v1253_v22  ;;  %v1278_v47 = vld [vmem:[#allocation8 + $0x48] sm:$0xff]   ;;  %v1280_v49 = vld [vmem:[#allocation8 + $0x40] sm:$0xff]   ;;  %p1421_p4 = scmp.ne.s32.totalorder %s1721_s15, %s1420_s16  ;;  %s1503_s22 = smov [#allocation10]  }
  0x75   : > { %579 = vmatprep.subr.bf16.mxu1 %v1254_v24  ;;  %v1279_v48 = vld [vmem:[#allocation8 + $0x8] sm:$0xff]   ;;  %v1281_v50 = vld [vmem:[#allocation8] sm:$0xff]   ;;  %s1424_s9 = sshll.u32 %s1503_s22, 4  ;;  %s1425_s9 = int_to_ptr.vmem [resolvable:$false] %s1424_s9 }
  0x76   : > { %p1422_p12 = pnand %p1421_p4, %p1794_p6  ;;  %s1426_s7 = scalar_lea.vmem %s1425_s9, 512 }
  0x77   : > { %527 = vmatpush1.bf16.msra.mxu0 %v1230_v14  ;;  %p1427_p5 = scmp.lt.s32.totalorder %s1721_s15, %s1425_s9  ;;  %p1428_p3 = scmp.lt.s32.totalorder %s1426_s7, %s1420_s16 }
  0x78   : > { %528 = vmatprep.subr.bf16.mxu0 %v1231_v16  ;;  %580 = vmatpush1.bf16.msra.mxu1 %v1256_v25  ;;  %p1423_p0 = pneg %p1422_p12 }
  0x79   : > { %581 = vmatprep.subr.bf16.mxu1 %v1257_v27  ;;  %p1429_p7 = por %p1428_p3, %p1427_p5 }
  0x7b   : > { %529 = vmatpush1.bf16.msra.mxu0 %v1233_v17  ;;  %p1430_p9 = pnand %p1429_p7, %p1423_p0 }
  0x7c   : > { %530 = vmatprep.subr.bf16.mxu0 %v1234_v20  ;;  %582 = vmatpush1.bf16.msra.mxu1 %v1259_v29 }
  0x7d   : > { %583 = vmatprep.subr.bf16.mxu1 %v1260_v30 }
  0x7f   : > { %531 = vmatpush1.bf16.msra.mxu0 %v1236_v21 }
  0x80   : > { %532 = vmatprep.subr.bf16.mxu0 %v1237_v23  ;;  %584 = vmatpush1.bf16.msra.mxu1 %v1262_v31 }
  0x81   : > { %585 = vmatprep.subr.bf16.mxu1 %v1263_v32 }
  0x83   : > { %533 = vmatpush1.bf16.msra.mxu0 %v1241_v26 }
  0x84   : > { %586 = vmatpush1.bf16.msra.mxu1 %v1265_v34  ;;  %1088 = vmatprep.subr.bf16.mxu0 %v1266_v35 }
  0x85   : > { %1116 = vmatprep.subr.bf16.mxu1 %v1266_v35 }
  0x86   : > { %551 = vmatmul.mubr.bf16.vlgmr.msra.gmra.mxu0 %v1243_v28 }
  0x87   : > { %560 = vmatprep.mubr.bf16.mxu0 %v1502_v0  ;;  %604 = vmatmul.mubr.bf16.vlgmr.msra.gmra.mxu1 %v1243_v28 }
  0x88   : > { %613 = vmatprep.mubr.bf16.mxu1 %v1502_v0  ;;  %1089 = vmatpush3.bf16.msra.mxu0 %v1267_v36 }
  0x89   : > { %1124 = vmatpush3.bf16.msra.mxu1 %v1267_v36  ;;  %1090 = vmatprep.subr.bf16.mxu0 %v1268_v37 }
  0x8a   : > { %1117 = vmatprep.subr.bf16.mxu1 %v1268_v37 }
  0x8c   : > { %1091 = vmatpush3.bf16.msra.mxu0 %v1269_v38 }
  0x8d   : > { %1125 = vmatpush3.bf16.msra.mxu1 %v1269_v38  ;;  %1092 = vmatprep.subr.bf16.mxu0 %v1270_v39 }
  0x8e   : > { %561 = vmatmul.mubr.bf16.gmra.mxu0 %v1250_v33  ;;  %1118 = vmatprep.subr.bf16.mxu1 %v1270_v39 }
  0x8f   : > { %614 = vmatmul.mubr.bf16.gmra.mxu1 %v1250_v33 }
  0x90   : > { %1093 = vmatpush3.bf16.msra.mxu0 %v1271_v40 }
  0x91   : > { %1126 = vmatpush3.bf16.msra.mxu1 %v1271_v40  ;;  %1094 = vmatprep.subr.bf16.mxu0 %v1272_v41 }
  0x92   : > { %1119 = vmatprep.subr.bf16.mxu1 %v1272_v41 }
  0x94   : > { %1095 = vmatpush3.bf16.msra.mxu0 %v1273_v42 }
  0x95   : > { %1127 = vmatpush3.bf16.msra.mxu1 %v1273_v42  ;;  %1096 = vmatprep.subr.bf16.mxu0 %v1274_v43 }
  0x96   : > { %1120 = vmatprep.subr.bf16.mxu1 %v1274_v43  ;;  %v336_v43 = vsub.s32 2, %v1703_v52 }
  0x98   : > { %1097 = vmatpush3.bf16.msra.mxu0 %v1275_v44 }
  0x99   : > { %1128 = vmatpush3.bf16.msra.mxu1 %v1275_v44  ;;  %1098 = vmatprep.subr.bf16.mxu0 %v1276_v45 }
  0x9a   : > { %1121 = vmatprep.subr.bf16.mxu1 %v1276_v45  ;;  %v340_v45 = vsub.s32 3, %v1703_v52 }
  0x9c   : > { %1099 = vmatpush3.bf16.msra.mxu0 %v1277_v46 }
  0x9d   : > { %1129 = vmatpush3.bf16.msra.mxu1 %v1277_v46  ;;  %1100 = vmatprep.subr.bf16.mxu0 %v1278_v47 }
  0x9e   : > { %1122 = vmatprep.subr.bf16.mxu1 %v1278_v47 }
  0xa0   : > { %1101 = vmatpush3.bf16.msra.mxu0 %v1279_v48 }
  0xa1   : > { %1130 = vmatpush3.bf16.msra.mxu1 %v1279_v48  ;;  %1102 = vmatprep.subr.bf16.mxu0 %v1280_v49 }
  0xa2   : > { %1123 = vmatprep.subr.bf16.mxu1 %v1280_v49  ;;  %v337_v49 = vrot.slane %v1706_v54, %v336_v43 }
  0xa4   : > { %1103 = vmatpush3.bf16.msra.mxu0 %v1281_v50 }
  0xa5   : > { %1131 = vmatpush3.bf16.msra.mxu1 %v1281_v50  ;;  %v341_v50 = vrot.slane %v1706_v54, %v340_v45 }
 0x146   : > { %v552_v58 = vpop.f32.mrf.mxu0 }
 0x147   : > { %v553_v59 = vadd.f32 %v552_v58, %v329_v56  ;;  %v605_v25 = vpop.f32.mrf.mxu1 }
 0x148   : > { %v554_v60 = vpop.f32.mrf.mxu0 }
 0x149   : > { %v624_v61 = vsub.f32 0.0, %v553_v59  ;;  %v555_v62 = vadd.f32 %v554_v60, %v333_v57  ;;  %v607_v29 = vpop.f32.mrf.mxu1 }
 0x14a   : > { %v556_v63 = vpop.f32.mrf.mxu0  ;;  %v608_v59 = vadd.f32 %v607_v29, %v341_v50 }
 0x14b   : > { %v632_v0 = vmul.f32 1.442695, %v624_v61  ;;  %v625_v1 = vsub.f32 0.0, %v555_v62  ;;  %v557_v2 = vadd.f32 %v556_v63, %v329_v56  ;;  %v609_v35 = vpop.f32.mrf.mxu1 }
 0x14c   : > { %v558_v3 = vpop.f32.mrf.mxu0 }
 0x14d   : > { %v634_v4 = vmul.f32 1.442695, %v625_v1  ;;  %v626_v5 = vsub.f32 0.0, %v557_v2  ;;  %v559_v6 = vadd.f32 %v558_v3, %v333_v57  ;;  %1282 = vpow2.f32 %v632_v0  ;;  %v611_v39 = vpop.f32.mrf.mxu1 }
 0x14e   : > { %v562_v7 = vpop.f32.mrf.mxu0  ;;  %v612_v60 = vadd.f32 %v611_v39, %v341_v50 }
 0x14f   : > { %1284 = vpow2.f32 %v634_v4  ;;  %v636_v8 = vmul.f32 1.442695, %v626_v5  ;;  %v627_v9 = vsub.f32 0.0, %v559_v6  ;;  %v563_v10 = vadd.f32 %v562_v7, %v329_v56  ;;  %v615_v47 = vpop.f32.mrf.mxu1 }
 0x150   : > { %v564_v11 = vpop.f32.mrf.mxu0  ;;  %v616_v6 = vadd.f32 %v615_v47, %v337_v49 }
 0x151   : > { %1286 = vpow2.f32 %v636_v8  ;;  %v638_v12 = vmul.f32 1.442695, %v627_v9  ;;  %v628_v13 = vsub.f32 0.0, %v563_v10  ;;  %v565_v14 = vadd.f32 %v564_v11, %v333_v57  ;;  %v617_v51 = vpop.f32.mrf.mxu1 }
 0x152   : > { %v566_v15 = vpop.f32.mrf.mxu0  ;;  %v618_v9 = vadd.f32 %v617_v51, %v341_v50 }
 0x153   : > { %1288 = vpow2.f32 %v638_v12  ;;  %v640_v16 = vmul.f32 1.442695, %v628_v13  ;;  %v629_v17 = vsub.f32 0.0, %v565_v14  ;;  %v567_v18 = vadd.f32 %v566_v15, %v329_v56  ;;  %v619_v62 = vpop.f32.mrf.mxu1 }
 0x154   : > { %v568_v19 = vpop.f32.mrf.mxu0  ;;  %v606_v56 = vadd.f32 %v605_v25, %v337_v49  ;;  %v620_v7 = vadd.f32 %v619_v62, %v337_v49 }
 0x155   : > { %v642_v20 = vmul.f32 1.442695, %v629_v17  ;;  %v630_v21 = vsub.f32 0.0, %v567_v18  ;;  %v569_v22 = vadd.f32 %v568_v19, %v333_v57  ;;  %1290 = vpow2.f32 %v640_v16  ;;  %v621_v4 = vpop.f32.mrf.mxu1 }
 0x156   : > { %v610_v57 = vadd.f32 %v609_v35, %v337_v49  ;;  %v622_v10 = vadd.f32 %v621_v4, %v341_v50 }
 0x157   : > { %1292 = vpow2.f32 %v642_v20  ;;  %v644_v23 = vmul.f32 1.442695, %v630_v21  ;;  %v631_v24 = vsub.f32 0.0, %v569_v22  ;;  %v1045_v22 = vld [vmem:[%s1773_s4] ss:$0 sm:$0xff] }
 0x159   : > { %1294 = vpow2.f32 %v644_v23  ;;  %v646_v26 = vmul.f32 1.442695, %v631_v24 }
 0x15a   : > { %v1283_v27 = vpop.eup %1282 }
 0x15b   : > { %1296 = vpow2.f32 %v646_v26  ;;  %v648_v32 = vadd.f32 1.0, %v1283_v27 }
 0x15c   : > { %v1285_v28 = vpop.eup %1284 }
 0x15d   : > { %v649_v30 = vadd.f32 1.0, %v1285_v28 }
 0x15e   : > { %v1287_v31 = vpop.eup %1286 }
 0x15f   : > { %v650_v33 = vadd.f32 1.0, %v1287_v31  ;;  %1298 = vrcp.f32 %v649_v30 }
 0x160   : > { %v1289_v34 = vpop.eup %1288 }
 0x161   : > { %1300 = vrcp.f32 %v650_v33  ;;  %v651_v36 = vadd.f32 1.0, %v1289_v34 }
 0x162   : > { %1302 = vrcp.f32 %v648_v32  ;;  %v1291_v37 = vpop.eup %1290 }
 0x163   : > { %1304 = vrcp.f32 %v651_v36  ;;  %v652_v42 = vadd.f32 1.0, %v1291_v37 }
 0x164   : > { %v1293_v38 = vpop.eup %1292 }
 0x165   : > { %v653_v40 = vadd.f32 1.0, %v1293_v38 }
 0x166   : > { %v1295_v41 = vpop.eup %1294 }
 0x167   : > { %v654_v44 = vadd.f32 1.0, %v1295_v41  ;;  %1306 = vrcp.f32 %v653_v40 }
 0x168   : > { %v1297_v46 = vpop.eup %1296 }
 0x169   : > { %1308 = vrcp.f32 %v654_v44  ;;  %v655_v48 = vadd.f32 1.0, %v1297_v46 }
 0x16a   : > { %1310 = vrcp.f32 %v652_v42 }
 0x16b   : > { %1312 = vrcp.f32 %v655_v48 }
 0x16c   : > { %v1299_v53 = vpop.eup %1298 }
 0x16d   : > { %v665_v63 = vmul.f32 %v1299_v53, %v608_v59 }
 0x16e   : > { %v1301_v55 = vpop.eup %1300 }
 0x16f   : > { %v1303_v58 = vpop.eup %1302  ;;  %v666_v61 = vmul.f32 %v1301_v55, %v610_v57 }
 0x170   : > { %v1305_v52 = vpop.eup %1304  ;;  %v664_v1 = vmul.f32 %v1303_v58, %v606_v56 }
 0x171   : > { %v667_v0 = vmul.f32 %v1305_v52, %v612_v60 }
 0x172   : > { %v672_v3 = vpack.c.bf16 %v666_v61, %v664_v1 }
 0x173   : > { %v673_v2 = vpack.c.bf16 %v667_v0, %v665_v63 }
 0x174   : > { %v1307_v5 = vpop.eup %1306 }
 0x175   : > { %843 = vmatprep.mubr.bf16.mxu0 %v673_v2  ;;  %v669_v13 = vmul.f32 %v1307_v5, %v618_v9 }
 0x176   : > { %v1309_v54 = vpop.eup %1308  ;;  %844 = vmatmul.mubr.bf16.vlgmr.msra.gmra.mxu0 %v672_v3 }
 0x177   : > { %v1311_v8 = vpop.eup %1310  ;;  %v670_v12 = vmul.f32 %v1309_v54, %v620_v7 }
 0x178   : > { %v1313_v11 = vpop.eup %1312  ;;  %v668_v15 = vmul.f32 %v1311_v8, %v616_v6 }
 0x179   : > { %v671_v14 = vmul.f32 %v1313_v11, %v622_v10 }
 0x17a   : > { %v674_v17 = vpack.c.bf16 %v670_v12, %v668_v15 }
 0x17b   : > { %v675_v16 = vpack.c.bf16 %v671_v14, %v669_v13 }
 0x17d   : > { %851 = vmatprep.mubr.bf16.mxu1 %v675_v16 }
 0x17e   : > { %852 = vmatmul.mubr.bf16.vlgmr.msra.gmra.mxu1 %v674_v17 }
 0x236   : > { %v1104_v18 = vpop.f32.mrf.mxu0 }
 0x238   : > { %v1105_v19 = vpop.f32.mrf.mxu0 }
 0x239   : > { %v1106_v21 = vadd.f32 %v1105_v19, %v1104_v18 }
 0x23a   : > { %v1107_v20 = vpop.f32.mrf.mxu0 }
 0x23b   : > { %v846_v26 = vadd.f32 %v1106_v21, %v1045_v22 }
 0x23c   : > { %v1108_v23 = vpop.f32.mrf.mxu0 }
 0x23d   : > { %v1109_v24 = vadd.f32 %v1108_v23, %v1107_v20 }
 0x23e   : > { %v1110_v25 = vpop.f32.mrf.mxu1 }
 0x23f   : > { %v849_v27 = vadd.f32 %v1109_v24, %v1045_v22 }
 0x240   : > { %v1111_v28 = vpop.f32.mrf.mxu1 }
 0x241   : > { %v1080_v29 = vpack.c.bf16 %v849_v27, %v846_v26  ;;  %v1112_v31 = vadd.f32 %v1111_v28, %v1110_v25 }
 0x242   : > { %v1113_v30 = vpop.f32.mrf.mxu1 }
 0x243   : > { %1081 = vst [vmem:[%s284_s27] sm:$0xff] %v1080_v29   ;;  %v854_v34 = vadd.f32 %v1112_v31, %v1045_v22 }
 0x244   : > { %v1114_v32 = vpop.f32.mrf.mxu1 }
 0x245   : > { %v1115_v33 = vadd.f32 %v1114_v32, %v1113_v30 }
 0x247   : > { %v857_v35 = vadd.f32 %v1115_v33, %v1045_v22 }
 0x249   : > { %v1085_v36 = vpack.c.bf16 %v857_v35, %v854_v34 }
 0x24b   : > { %1087 = vst [vmem:[%s284_s27 + $0x8] sm:$0xff] %v1085_v36  }
 0x24c   : > { %1433 = shalt.err (!%p1430_p9)
}
 0x24d   : > { %s1434_s23 = scalar_lea.hbm %s1726_s14, 256  ;;  %s1438_s24 = scalar_lea.hbm %s1774_s5, 512 }
 0x24e   : > { %p1435_p1 = scmp.ne.s32.totalorder %s1726_s14, %s1434_s23  ;;  %p1439_p11 = scmp.lt.s32.totalorder %s1726_s14, %s1774_s5 }
 0x24f   : > { %p1440_p13 = scmp.lt.s32.totalorder %s1438_s24, %s1434_s23 }
 0x250   : > { %p1436_p8 = pnand %p1435_p1, %p1794_p6 }
 0x251   : > { %p1441_p2 = por %p1440_p13, %p1439_p11 }
 0x252   : > { %p1437_p10 = pneg %p1436_p8 }
 0x254   : > { %p1442_p4 = pnand %p1441_p2, %p1437_p10 }
 0x256   : > { %1445 = shalt.err (!%p1442_p4)
}
 0x257   : > { %s1504_s17 = smov 64   ;;  %s1505_s30 = smov 4  }
 0x258   : > { %1146 = dma.vmem_to_hbm [thread:$0]  (%p1794_p6), %s1721_s15, 256, %s1726_s14, %s881_s11, %s1504_s17, %s1504_s17, %s1505_s30  }
 0x259 PF: > { %s909_s13 = sand.u32 1, %s1480_s18   ;;  %p1795_p12 = scmp.ne.s32.totalorder %s1781_s25, 0 }
 0x25a   : > { %p1796_p0 = scmp.ge.s32.totalorder %s1492_s21, 2  ;;  %s910_s16 = scalar_lea.sflag [#allocation4], %s909_s13 }
 0x25c   : > { %p1163_p5 = pnand %p1796_p0, %p1795_p12 }
 0x25e   : > { %p1164_p3 = pneg %p1163_p5 }
 0x260   : > { %1475 = dma.done.wait (%p1164_p3), %s910_s16, 256  }
 0x261   : > { %1477 = vsyncadd (%p1164_p3), %s910_s16, 4294967040  ;;  %p20_p7 = scmp.ge.s32.totalorder %s1619_s6, 4   ;;  %s1797_s18 = smov %s1484_s19 }
 0x262   : > { %s1798_s19 = smov %s1488_s20  ;;  %s1799_s20 = smov %s1629_s10 }
 0x263   : > { %s1800_s21 = smov %s1619_s6  ;;  %22 = sbr.rel (!%p20_p7) target bundleno = 7 (0x7), region = 97 }
 0x268   :  { %915 = vsyncpa [#allocation3], 1 }
 0x269   :  { %917 = vsyncpa [#allocation3 + $0x1], 1 }
 0x26a   :  { %918 = vsyncpa [#allocation6], 1 }
 0x26b   :  { %919 = vsyncpa [#allocation9], 1 }
 0x26c   :  { %920 = vsyncpa [#allocation4], 1 }
 0x26d   :  { %922 = vsyncpa [#allocation4 + $0x1], 1 }

// kernel: tpu_custom_call.1
= control target key start
LH: loop header
LB: loop body
LE: loop exit
PB: predicated region body
PF: predicated region fallthrough
CT: control target
= control target key end

     0   :  { %10 = vsyncpa [#allocation3], 0  ;;  %s1769_s0 = inlined_call_operand.hbm [shape: bf16[64,128], index: 0, kind: input, shape index: {}]   ;;  %s1770_s1 = inlined_call_operand.hbm [shape: bf16[128,512], index: 1, kind: input, shape index: {}]   ;;  %s1771_s2 = inlined_call_operand.hbm [shape: f32[1,512], index: 2, kind: input, shape index: {}]   ;;  %s1772_s3 = inlined_call_operand.hbm [shape: bf16[256,128], index: 3, kind: input, shape index: {}]   ;;  %s1773_s4 = inlined_call_operand.vmem [shape: f32[1,128], index: 4, kind: input, shape index: {}]   ;;  %s1774_s5 = inlined_call_operand.hbm [shape: bf16[64,128], index: 5, kind: output, shape index: {}]  }
   0x1   :  { %12 = vsyncpa [#allocation3 + $0x1], 0 }
   0x2   :  { %13 = vsyncpa [#allocation6], 0 }
   0x3   :  { %14 = vsyncpa [#allocation9], 0 }
   0x4   :  { %15 = vsyncpa [#allocation4], 0 }
   0x5   :  { %17 = vsyncpa [#allocation4 + $0x1], 0  ;;  %s1536_s18 = smov 0   ;;  %s1538_s19 = smov 0  }
   0x6   :  { %s1540_s20 = smov 0   ;;  %s1542_s21 = smov 0  }
   0x7 LB: > { %s1557_s22 = sadd.s32 4294967295, %s1492_s21   ;;  %s996_s23 = sadd.s32 4294967294, %s1492_s21   ;;  %s1492_s21 = sphi %s1542_s21, %s1800_s21   ;;  %s1488_s20 = sphi %s1540_s20, %s1799_s20   ;;  %s1484_s19 = sphi %s1538_s19, %s1798_s19   ;;  %s1480_s18 = sphi %s1536_s18, %s1797_s18  }
   0x8   : > { %p43_p0 = scmp.ne.s32.totalorder %s1484_s19, %s1480_s18  ;;  %p1775_p1 = scmp.eq.s32.totalorder %s1557_s22, 0 }
   0x9   : > { %p157_p3 = scmp.eq.s32.totalorder %s996_s23, 1  ;;  %p997_p5 = scmp.ge.s32.totalorder %s1492_s21, 1 }
   0xa   : > { %p1566_p4 = por %p1775_p1, %p43_p0  ;;  %p164_p7 = scmp.lt.s32.totalorder %s1492_s21, 3 }
   0xb   : > { %p1571_p6 = por %p157_p3, %p43_p0  ;;  %s1494_s27 = smov [#allocation5]  }
   0xc   : > { %s1780_s24 = scalar_select %p1566_p4, 1, 0 }
   0xd   : > { %s1781_s25 = scalar_select %p1571_p6, 1, 0 }
   0xe   : > { %p1576_p8 = pnand %p997_p5, %p164_p7  ;;  %s176_s28 = sshll.u32 %s1494_s27, 4  ;;  %s177_s28 = int_to_ptr.vmem [resolvable:$true] %s176_s28 }
   0xf   : > { %s1495_s30 = smov [#allocation7]   ;;  %s1496_s7 = smov [#allocation8]  }
  0x10   : > { %s1782_s26 = scalar_select %p1576_p8, 1, 0 }
  0x11   : > { %p1148_p9 = pneg %p1576_p8  ;;  %s190_s6 = sshll.u32 %s1495_s30, 4  ;;  %s191_s6 = int_to_ptr.vmem [resolvable:$true] %s190_s6 }
  0x12   : > { %s200_s8 = sshll.u32 %s1496_s7, 4  ;;  %s1325_s9 = scalar_lea.vmem %s177_s28, 4096  ;;  %s201_s8 = int_to_ptr.vmem [resolvable:$true] %s200_s8 }
  0x13   : > { %p1585_p11 = pnand %p1148_p9, %p1775_p1  ;;  %p1326_p13 = scmp.ne.s32.totalorder %s177_s28, %s1325_s9 }
  0x14   : > { %p1333_p5 = scmp.lt.s32.totalorder %s177_s28, %s177_s28  ;;  %p1334_p7 = scmp.lt.s32.totalorder %s1325_s9, %s1325_s9 }
  0x15   : > { %p1316_p12 = pneg %p1585_p11 }
  0x16   : > { %p1335_p9 = por %p1334_p7, %p1333_p5 }
  0x17   : > { %p1328_p0 = pnand %p1326_p13, %p1316_p12 }
  0x19   : > { %p1329_p3 = pneg %p1328_p0 }
  0x1b   : > { %p1336_p10 = pnand %p1335_p9, %p1329_p3 }
  0x1d   : > { %1339 = shalt.err (!%p1336_p10)
}
  0x1e   : > { %s1497_s10 = smov 256   ;;  %s1498_s11 = smov 16  }
  0x1f   : > { %1151 = dma.hbm_to_vmem [thread:$0]  (!%p1585_p11), %s1770_s1, 4096, %s177_s28, [#allocation6], %s1497_s10, %s1497_s10, %s1498_s11  }
  0x20   : > { %s1351_s14 = scalar_lea.vmem %s191_s6, 64  ;;  %p1359_p2 = scmp.lt.s32.totalorder %s191_s6, %s191_s6 }
  0x21   : > { %p1352_p1 = scmp.ne.s32.totalorder %s191_s6, %s1351_s14  ;;  %p1360_p6 = scmp.lt.s32.totalorder %s1351_s14, %s1351_s14 }
  0x23   : > { %p1354_p13 = pnand %p1352_p1, %p1316_p12  ;;  %p1361_p5 = por %p1360_p6, %p1359_p2 }
  0x25   : > { %p1355_p0 = pneg %p1354_p13 }
  0x27   : > { %p1362_p3 = pnand %p1361_p5, %p1355_p0 }
  0x29   : > { %1365 = shalt.err (!%p1362_p3)
}
  0x2a   : > { %1154 = dma.hbm_to_vmem [thread:$0]  (!%p1585_p11), %s1771_s2, 64, %s191_s6, [#allocation6]  }
  0x2b   : > { %s1377_s17 = scalar_lea.vmem %s201_s8, 2048  ;;  %p1385_p9 = scmp.lt.s32.totalorder %s201_s8, %s201_s8 }
  0x2c   : > { %p1378_p10 = scmp.ne.s32.totalorder %s201_s8, %s1377_s17  ;;  %p1386_p13 = scmp.lt.s32.totalorder %s1377_s17, %s1377_s17 }
  0x2e   : > { %p1380_p7 = pnand %p1378_p10, %p1316_p12  ;;  %p1387_p4 = por %p1386_p13, %p1385_p9 }
  0x30   : > { %p1381_p1 = pneg %p1380_p7 }
  0x32   : > { %p1388_p2 = pnand %p1387_p4, %p1381_p1 }
  0x34   : > { %1391 = shalt.err (!%p1388_p2)
}
  0x35   : > { %s1777_s23 = smov 64   ;;  %s1500_s27 = smov 4  }
  0x36   : > { %1157 = dma.hbm_to_vmem [thread:$0]  (!%p1585_p11), %s1772_s3, 2048, %s201_s8, [#allocation9], %s1777_s23, %s1777_s23, %s1500_s27  }
  0x37   : > { %s1619_s6 = sadd.s32 1, %s1492_s21   ;;  %s30_s9 = sadd.s32 1, %s1488_s20 }
  0x38   : > { %s27_s7 = ssub.s32 %s1492_s21, %s1619_s6  ;;  %p37_p6 = scmp.ne.s32.totalorder %s1488_s20, %s1484_s19 }
  0x39   : > { %p28_p4 = scmp.eq.s32.totalorder %s27_s7, 0  ;;  %p38_p12 = scmp.eq.s32.totalorder %s1492_s21, 0 }
  0x3a   : > { %p1169_p0 = scmp.lt.s32.totalorder %s1492_s21, 2  ;;  %p1784_p3 = scmp.eq.s32.totalorder %s1557_s22, 1 }
  0x3b   : > { %s1629_s10 = scalar_select %p28_p4, %s1488_s20, %s30_s9  }
  0x3c   : > { %p39_p5 = por %p38_p12, %p37_p6  ;;  %p1633_p10 = por %p1784_p3, %p37_p6 }
  0x3d   : > { %s217_s11 = sand.u32 1, %s1488_s20   ;;  %s1071_s12 = sshll.u32 %s1492_s21, 8 }
  0x3e   : > { %s1785_s29 = scalar_select %p1633_p10, 1, 0 }
  0x3f   : > { %s1002_s8 = sshll.u32 %s217_s11, 4  ;;  %s1642_s15 = scalar_lea.hbm %s1769_s0, %s1071_s12 }
  0x40   : > { %s221_s16 = scalar_lea.vmem [#allocation2], %s1002_s8  ;;  %p1644_p11 = pnand %p1169_p0, %p39_p5 }
  0x41   : > { %s228_s17 = sshll.u32 %s221_s16, 4  ;;  %s1650_s30 = scalar_lea.sflag [#allocation3], %s217_s11  ;;  %s1648_s17 = int_to_ptr.vmem [resolvable:$true] %s228_s17 }
  0x42   : > { %s1392_s7 = scalar_lea.hbm %s1642_s15, 256  ;;  %p1394_p1 = pneg %p1644_p11 }
  0x43   : > { %p1393_p7 = scmp.ne.s32.totalorder %s1642_s15, %s1392_s7  ;;  %s1397_s8 = scalar_lea.hbm %s1769_s0, 512 }
  0x44   : > { %p1398_p2 = scmp.lt.s32.totalorder %s1642_s15, %s1769_s0  ;;  %p1399_p4 = scmp.lt.s32.totalorder %s1397_s8, %s1392_s7 }
  0x45   : > { %p1395_p9 = pnand %p1394_p1, %p1393_p7 }
  0x46   : > { %p1400_p6 = por %p1399_p4, %p1398_p2 }
  0x47   : > { %p1396_p13 = pneg %p1395_p9 }
  0x49   : > { %p1401_p12 = pnand %p1400_p6, %p1396_p13 }
  0x4b   : > { %1404 = shalt.err (!%p1401_p12)
}
  0x4c   : > { %s1405_s11 = scalar_lea.vmem %s1648_s17, 256  ;;  %s1501_s16 = smov [#allocation2]  }
  0x4d   : > { %p1406_p0 = scmp.ne.s32.totalorder %s1648_s17, %s1405_s11  ;;  %s1410_s23 = sshll.u32 %s1501_s16, 4  ;;  %s1411_s23 = int_to_ptr.vmem [resolvable:$false] %s1410_s23 }
  0x4e   : > { %s1412_s9 = scalar_lea.vmem %s1411_s23, 512  ;;  %p1413_p7 = scmp.lt.s32.totalorder %s1648_s17, %s1411_s23 }
  0x4f   : > { %p1408_p5 = pnand %p1406_p0, %p1394_p1  ;;  %p1414_p9 = scmp.lt.s32.totalorder %s1412_s9, %s1405_s11 }
  0x51   : > { %p1409_p3 = pneg %p1408_p5  ;;  %p1415_p10 = por %p1414_p9, %p1413_p7 }
  0x53   : > { %p1416_p8 = pnand %p1415_p10, %p1409_p3 }
  0x55   : > { %1419 = shalt.err (!%p1416_p8)
}
  0x56   : > { %s1787_s7 = smov 64   ;;  %p1788_p1 = scmp.ne.s32.totalorder %s1782_s26, 0 }
  0x57   : > { %1161 = dma.hbm_to_vmem [thread:$0]  (!%p1644_p11), %s1642_s15, 256, %s1648_s17, %s1650_s30, %s1787_s7, %s1787_s7, %s1500_s27  }
  0x58   : > { %240 = sbr.rel (%p1788_p1) target bundleno = 601 (0x259), region = 40  ;;  %s1677_s12 = sand.u32 (!%p1788_p1), 1, %s1484_s19  }
  0x59   : > { %s1006_s23 = sshll.u32 (!%p1788_p1), %s1677_s12, 4  ;;  %s243_s8 = scalar_lea.sflag (!%p1788_p1), [#allocation3], %s1677_s12 }
  0x5a   : > { %s1683_s28 = scalar_lea.vmem (!%p1788_p1), [#allocation2], %s1006_s23  ;;  %p1789_p8 = scmp.ne.s32.totalorder (!%p1788_p1), %s1780_s24, 0 }
  0x5d   : > { %1463 = dma.done.wait (%p1789_p8), %s243_s8, 256  }
  0x5e   : > { %1465 = vsyncadd (%p1789_p8), %s243_s8, 4294967040  ;;  %p1790_p10 = scmp.eq.s32.totalorder %s1557_s22, 0 }
  0x60   : > { %1467 = dma.done.wait (%p1790_p10), [#allocation6], 4160   ;;  %p1791_p11 = pmov %p1790_p10 }
  0x61   : > { %p1792_p13 = pmov %p1790_p10 }
  0x62   : > { %1469 = vsyncadd (%p1791_p11), [#allocation6], 4294963136 }
  0x63   : > { %1471 = dma.done.wait (%p1792_p13), [#allocation9], 2048   ;;  %p1793_p2 = pmov %p1790_p10 }
  0x64   : > { %v1502_v0 = vmov 0   ;;  %v1216_v1 = vld [vmem:[#allocation5 + $0xe4] ss:$16 sps:$4 sm:$0xff]   ;;  %v1218_v2 = vld [vmem:[#allocation5 + $0xe0] ss:$16 sps:$4 sm:$0xff]   ;;  %v1250_v33 = vld [vmem:[%s1683_s28 + $0x8] sm:$0xff]   ;;  %v326_v51 = vlaneseq }
  0x65   : > { %1473 = vsyncadd (%p1793_p2), [#allocation9], 4294965248  ;;  %550 = vmatprep.mubr.bf16.mxu0 %v1502_v0  ;;  %603 = vmatprep.mubr.bf16.mxu1 %v1502_v0  ;;  %v1219_v3 = vld [vmem:[#allocation5 + $0xc4] ss:$16 sps:$4 sm:$0xff]   ;;  %v1221_v4 = vld [vmem:[#allocation5 + $0xc0] ss:$16 sps:$4 sm:$0xff]  }
  0x66   : > { %518 = vmatprep.subr.bf16.mxu0 %v1216_v1  ;;  %v1222_v5 = vld [vmem:[#allocation5 + $0xa4] ss:$16 sps:$4 sm:$0xff]   ;;  %v1224_v6 = vld [vmem:[#allocation5 + $0xa0] ss:$16 sps:$4 sm:$0xff]   ;;  %v1239_v9 = vld [vmem:[#allocation5 + $0xec] ss:$16 sps:$4 sm:$0xff]  }
  0x67   : > { %519 = vmatpush1.bf16.msra.mxu0 %v1218_v2  ;;  %v1225_v7 = vld [vmem:[#allocation5 + $0x84] ss:$16 sps:$4 sm:$0xff]   ;;  %v1227_v8 = vld [vmem:[#allocation5 + $0x80] ss:$16 sps:$4 sm:$0xff]   ;;  %v1242_v10 = vld [vmem:[#allocation5 + $0xe8] ss:$16 sps:$4 sm:$0xff]   ;;  %571 = vmatprep.subr.bf16.mxu1 %v1239_v9 }
  0x68   : > { %520 = vmatprep.subr.bf16.mxu0 %v1219_v3  ;;  %v1228_v11 = vld [vmem:[#allocation5 + $0x64] ss:$16 sps:$4 sm:$0xff]   ;;  %v1244_v12 = vld [vmem:[#allocation5 + $0xcc] ss:$16 sps:$4 sm:$0xff]   ;;  %572 = vmatpush1.bf16.msra.mxu1 %v1242_v10  ;;  %v1246_v13 = vld [vmem:[#allocation5 + $0xc8] ss:$16 sps:$4 sm:$0xff]  }
  0x69   : > { %v1230_v14 = vld [vmem:[#allocation5 + $0x60] ss:$16 sps:$4 sm:$0xff]   ;;  %573 = vmatprep.subr.bf16.mxu1 %v1244_v12  ;;  %v1247_v15 = vld [vmem:[#allocation5 + $0xac] ss:$16 sps:$4 sm:$0xff]   ;;  %v1231_v16 = vld [vmem:[#allocation5 + $0x44] ss:$16 sps:$4 sm:$0xff]  }
  0x6a   : > { %v1233_v17 = vld [vmem:[#allocation5 + $0x40] ss:$16 sps:$4 sm:$0xff]   ;;  %v1249_v18 = vld [vmem:[#allocation5 + $0xa8] ss:$16 sps:$4 sm:$0xff]   ;;  %v1251_v19 = vld [vmem:[#allocation5 + $0x8c] ss:$16 sps:$4 sm:$0xff]  }
  0x6b   : > { %521 = vmatpush1.bf16.msra.mxu0 %v1221_v4  ;;  %v1234_v20 = vld [vmem:[#allocation5 + $0x24] ss:$16 sps:$4 sm:$0xff]   ;;  %v1236_v21 = vld [vmem:[#allocation5 + $0x20] ss:$16 sps:$4 sm:$0xff]   ;;  %v1253_v22 = vld [vmem:[#allocation5 + $0x88] ss:$16 sps:$4 sm:$0xff]  }
  0x6c   : > { %522 = vmatprep.subr.bf16.mxu0 %v1222_v5  ;;  %574 = vmatpush1.bf16.msra.mxu1 %v1246_v13  ;;  %v1237_v23 = vld [vmem:[#allocation5 + $0x4] ss:$16 sps:$4 sm:$0xff]   ;;  %v1254_v24 = vld [vmem:[#allocation5 + $0x6c] ss:$16 sps:$4 sm:$0xff]   ;;  %v1256_v25 = vld [vmem:[#allocation5 + $0x68] ss:$16 sps:$4 sm:$0xff]  }
  0x6d   : > { %575 = vmatprep.subr.bf16.mxu1 %v1247_v15  ;;  %v1241_v26 = vld [vmem:[#allocation5] ss:$16 sps:$4 sm:$0xff]   ;;  %v1257_v27 = vld [vmem:[#allocation5 + $0x4c] ss:$16 sps:$4 sm:$0xff]   ;;  %v1259_v29 = vld [vmem:[#allocation5 + $0x48] ss:$16 sps:$4 sm:$0xff]  }
  0x6e   : > { %v1243_v28 = vld [vmem:[%s1683_s28] sm:$0xff]   ;;  %v1260_v30 = vld [vmem:[#allocation5 + $0x2c] ss:$16 sps:$4 sm:$0xff]   ;;  %v1262_v31 = vld [vmem:[#allocation5 + $0x28] ss:$16 sps:$4 sm:$0xff]   ;;  %v1703_v52 = vshrl.u32 %v326_v51, 7 }
  0x6f   : > { %523 = vmatpush1.bf16.msra.mxu0 %v1224_v6  ;;  %v1263_v32 = vld [vmem:[#allocation5 + $0xc] ss:$16 sps:$4 sm:$0xff]   ;;  %v1265_v34 = vld [vmem:[#allocation5 + $0x8] ss:$16 sps:$4 sm:$0xff]   ;;  %v1706_v54 = vld [vmem:[#allocation7] sm:$0xf] }
  0x70   : > { %524 = vmatprep.subr.bf16.mxu0 %v1225_v7  ;;  %576 = vmatpush1.bf16.msra.mxu1 %v1249_v18  ;;  %v1266_v35 = vld [vmem:[#allocation8 + $0x78] sm:$0xff]   ;;  %v1268_v37 = vld [vmem:[#allocation8 + $0x70] sm:$0xff]   ;;  %v1270_v39 = vld [vmem:[#allocation8 + $0x68] sm:$0xff]   ;;  %v328_v53 = vsub.s32 0, %v1703_v52  ;;  %v332_v55 = vsub.s32 1, %v1703_v52  ;;  %s284_s27 = scalar_lea.vmem [#allocation10], %s1006_s23 }
  0x71   : > { %577 = vmatprep.subr.bf16.mxu1 %v1251_v19  ;;  %v1267_v36 = vld [vmem:[#allocation8 + $0x38] sm:$0xff]   ;;  %v1269_v38 = vld [vmem:[#allocation8 + $0x30] sm:$0xff]   ;;  %v1271_v40 = vld [vmem:[#allocation8 + $0x28] sm:$0xff]   ;;  %s894_s15 = sshll.u32 %s284_s27, 4  ;;  %s1076_s17 = sshll.u32 %s1557_s22, 8  ;;  %s1721_s15 = int_to_ptr.vmem [resolvable:$true] %s894_s15 }
  0x72   : > { %v1272_v41 = vld [vmem:[#allocation8 + $0x60] sm:$0xff]   ;;  %v1274_v43 = vld [vmem:[#allocation8 + $0x58] sm:$0xff]   ;;  %v1276_v45 = vld [vmem:[#allocation8 + $0x50] sm:$0xff]   ;;  %v329_v56 = vrot.slane %v1706_v54, %v328_v53  ;;  %v333_v57 = vrot.slane %v1706_v54, %v332_v55  ;;  %s1726_s14 = scalar_lea.hbm %s1774_s5, %s1076_s17  ;;  %s881_s11 = scalar_lea.sflag [#allocation4], %s1677_s12 }
  0x73   : > { %525 = vmatpush1.bf16.msra.mxu0 %v1227_v8  ;;  %v1273_v42 = vld [vmem:[#allocation8 + $0x20] sm:$0xff]   ;;  %v1275_v44 = vld [vmem:[#allocation8 + $0x18] sm:$0xff]   ;;  %v1277_v46 = vld [vmem:[#allocation8 + $0x10] sm:$0xff]   ;;  %s1420_s16 = scalar_lea.vmem %s1721_s15, 256  ;;  %p1794_p6 = scmp.ne.s32.totalorder %s1785_s29, 0 }
  0x74   : > { %526 = vmatprep.subr.bf16.mxu0 %v1228_v11  ;;  %578 = vmatpush1.bf16.msra.mxu1 %v1253_v22  ;;  %v1278_v47 = vld [vmem:[#allocation8 + $0x48] sm:$0xff]   ;;  %v1280_v49 = vld [vmem:[#allocation8 + $0x40] sm:$0xff]   ;;  %p1421_p4 = scmp.ne.s32.totalorder %s1721_s15, %s1420_s16  ;;  %s1503_s22 = smov [#allocation10]  }
  0x75   : > { %579 = vmatprep.subr.bf16.mxu1 %v1254_v24  ;;  %v1279_v48 = vld [vmem:[#allocation8 + $0x8] sm:$0xff]   ;;  %v1281_v50 = vld [vmem:[#allocation8] sm:$0xff]   ;;  %s1424_s9 = sshll.u32 %s1503_s22, 4  ;;  %s1425_s9 = int_to_ptr.vmem [resolvable:$false] %s1424_s9 }
  0x76   : > { %p1422_p12 = pnand %p1421_p4, %p1794_p6  ;;  %s1426_s7 = scalar_lea.vmem %s1425_s9, 512 }
  0x77   : > { %527 = vmatpush1.bf16.msra.mxu0 %v1230_v14  ;;  %p1427_p5 = scmp.lt.s32.totalorder %s1721_s15, %s1425_s9  ;;  %p1428_p3 = scmp.lt.s32.totalorder %s1426_s7, %s1420_s16 }
  0x78   : > { %528 = vmatprep.subr.bf16.mxu0 %v1231_v16  ;;  %580 = vmatpush1.bf16.msra.mxu1 %v1256_v25  ;;  %p1423_p0 = pneg %p1422_p12 }
  0x79   : > { %581 = vmatprep.subr.bf16.mxu1 %v1257_v27  ;;  %p1429_p7 = por %p1428_p3, %p1427_p5 }
  0x7b   : > { %529 = vmatpush1.bf16.msra.mxu0 %v1233_v17  ;;  %p1430_p9 = pnand %p1429_p7, %p1423_p0 }
  0x7c   : > { %530 = vmatprep.subr.bf16.mxu0 %v1234_v20  ;;  %582 = vmatpush1.bf16.msra.mxu1 %v1259_v29 }
  0x7d   : > { %583 = vmatprep.subr.bf16.mxu1 %v1260_v30 }
  0x7f   : > { %531 = vmatpush1.bf16.msra.mxu0 %v1236_v21 }
  0x80   : > { %532 = vmatprep.subr.bf16.mxu0 %v1237_v23  ;;  %584 = vmatpush1.bf16.msra.mxu1 %v1262_v31 }
  0x81   : > { %585 = vmatprep.subr.bf16.mxu1 %v1263_v32 }
  0x83   : > { %533 = vmatpush1.bf16.msra.mxu0 %v1241_v26 }
  0x84   : > { %586 = vmatpush1.bf16.msra.mxu1 %v1265_v34  ;;  %1088 = vmatprep.subr.bf16.mxu0 %v1266_v35 }
  0x85   : > { %1116 = vmatprep.subr.bf16.mxu1 %v1266_v35 }
  0x86   : > { %551 = vmatmul.mubr.bf16.vlgmr.msra.gmra.mxu0 %v1243_v28 }
  0x87   : > { %560 = vmatprep.mubr.bf16.mxu0 %v1502_v0  ;;  %604 = vmatmul.mubr.bf16.vlgmr.msra.gmra.mxu1 %v1243_v28 }
  0x88   : > { %613 = vmatprep.mubr.bf16.mxu1 %v1502_v0  ;;  %1089 = vmatpush3.bf16.msra.mxu0 %v1267_v36 }
  0x89   : > { %1124 = vmatpush3.bf16.msra.mxu1 %v1267_v36  ;;  %1090 = vmatprep.subr.bf16.mxu0 %v1268_v37 }
  0x8a   : > { %1117 = vmatprep.subr.bf16.mxu1 %v1268_v37 }
  0x8c   : > { %1091 = vmatpush3.bf16.msra.mxu0 %v1269_v38 }
  0x8d   : > { %1125 = vmatpush3.bf16.msra.mxu1 %v1269_v38  ;;  %1092 = vmatprep.subr.bf16.mxu0 %v1270_v39 }
  0x8e   : > { %561 = vmatmul.mubr.bf16.gmra.mxu0 %v1250_v33  ;;  %1118 = vmatprep.subr.bf16.mxu1 %v1270_v39 }
  0x8f   : > { %614 = vmatmul.mubr.bf16.gmra.mxu1 %v1250_v33 }
  0x90   : > { %1093 = vmatpush3.bf16.msra.mxu0 %v1271_v40 }
  0x91   : > { %1126 = vmatpush3.bf16.msra.mxu1 %v1271_v40  ;;  %1094 = vmatprep.subr.bf16.mxu0 %v1272_v41 }
  0x92   : > { %1119 = vmatprep.subr.bf16.mxu1 %v1272_v41 }
  0x94   : > { %1095 = vmatpush3.bf16.msra.mxu0 %v1273_v42 }
  0x95   : > { %1127 = vmatpush3.bf16.msra.mxu1 %v1273_v42  ;;  %1096 = vmatprep.subr.bf16.mxu0 %v1274_v43 }
  0x96   : > { %1120 = vmatprep.subr.bf16.mxu1 %v1274_v43  ;;  %v336_v43 = vsub.s32 2, %v1703_v52 }
  0x98   : > { %1097 = vmatpush3.bf16.msra.mxu0 %v1275_v44 }
  0x99   : > { %1128 = vmatpush3.bf16.msra.mxu1 %v1275_v44  ;;  %1098 = vmatprep.subr.bf16.mxu0 %v1276_v45 }
  0x9a   : > { %1121 = vmatprep.subr.bf16.mxu1 %v1276_v45  ;;  %v340_v45 = vsub.s32 3, %v1703_v52 }
  0x9c   : > { %1099 = vmatpush3.bf16.msra.mxu0 %v1277_v46 }
  0x9d   : > { %1129 = vmatpush3.bf16.msra.mxu1 %v1277_v46  ;;  %1100 = vmatprep.subr.bf16.mxu0 %v1278_v47 }
  0x9e   : > { %1122 = vmatprep.subr.bf16.mxu1 %v1278_v47 }
  0xa0   : > { %1101 = vmatpush3.bf16.msra.mxu0 %v1279_v48 }
  0xa1   : > { %1130 = vmatpush3.bf16.msra.mxu1 %v1279_v48  ;;  %1102 = vmatprep.subr.bf16.mxu0 %v1280_v49 }
  0xa2   : > { %1123 = vmatprep.subr.bf16.mxu1 %v1280_v49  ;;  %v337_v49 = vrot.slane %v1706_v54, %v336_v43 }
  0xa4   : > { %1103 = vmatpush3.bf16.msra.mxu0 %v1281_v50 }
  0xa5   : > { %1131 = vmatpush3.bf16.msra.mxu1 %v1281_v50  ;;  %v341_v50 = vrot.slane %v1706_v54, %v340_v45 }
 0x146   : > { %v552_v58 = vpop.f32.mrf.mxu0 }
 0x147   : > { %v553_v59 = vadd.f32 %v552_v58, %v329_v56  ;;  %v605_v25 = vpop.f32.mrf.mxu1 }
 0x148   : > { %v554_v60 = vpop.f32.mrf.mxu0 }
 0x149   : > { %v624_v61 = vsub.f32 0.0, %v553_v59  ;;  %v555_v62 = vadd.f32 %v554_v60, %v333_v57  ;;  %v607_v29 = vpop.f32.mrf.mxu1 }
 0x14a   : > { %v556_v63 = vpop.f32.mrf.mxu0  ;;  %v608_v59 = vadd.f32 %v607_v29, %v341_v50 }
 0x14b   : > { %v632_v0 = vmul.f32 1.442695, %v624_v61  ;;  %v625_v1 = vsub.f32 0.0, %v555_v62  ;;  %v557_v2 = vadd.f32 %v556_v63, %v329_v56  ;;  %v609_v35 = vpop.f32.mrf.mxu1 }
 0x14c   : > { %v558_v3 = vpop.f32.mrf.mxu0 }
 0x14d   : > { %v634_v4 = vmul.f32 1.442695, %v625_v1  ;;  %v626_v5 = vsub.f32 0.0, %v557_v2  ;;  %v559_v6 = vadd.f32 %v558_v3, %v333_v57  ;;  %1282 = vpow2.f32 %v632_v0  ;;  %v611_v39 = vpop.f32.mrf.mxu1 }
 0x14e   : > { %v562_v7 = vpop.f32.mrf.mxu0  ;;  %v612_v60 = vadd.f32 %v611_v39, %v341_v50 }
 0x14f   : > { %1284 = vpow2.f32 %v634_v4  ;;  %v636_v8 = vmul.f32 1.442695, %v626_v5  ;;  %v627_v9 = vsub.f32 0.0, %v559_v6  ;;  %v563_v10 = vadd.f32 %v562_v7, %v329_v56  ;;  %v615_v47 = vpop.f32.mrf.mxu1 }
 0x150   : > { %v564_v11 = vpop.f32.mrf.mxu0  ;;  %v616_v6 = vadd.f32 %v615_v47, %v337_v49 }
 0x151   : > { %1286 = vpow2.f32 %v636_v8  ;;  %v638_v12 = vmul.f32 1.442695, %v627_v9  ;;  %v628_v13 = vsub.f32 0.0, %v563_v10  ;;  %v565_v14 = vadd.f32 %v564_v11, %v333_v57  ;;  %v617_v51 = vpop.f32.mrf.mxu1 }
 0x152   : > { %v566_v15 = vpop.f32.mrf.mxu0  ;;  %v618_v9 = vadd.f32 %v617_v51, %v341_v50 }
 0x153   : > { %1288 = vpow2.f32 %v638_v12  ;;  %v640_v16 = vmul.f32 1.442695, %v628_v13  ;;  %v629_v17 = vsub.f32 0.0, %v565_v14  ;;  %v567_v18 = vadd.f32 %v566_v15, %v329_v56  ;;  %v619_v62 = vpop.f32.mrf.mxu1 }
 0x154   : > { %v568_v19 = vpop.f32.mrf.mxu0  ;;  %v606_v56 = vadd.f32 %v605_v25, %v337_v49  ;;  %v620_v7 = vadd.f32 %v619_v62, %v337_v49 }
 0x155   : > { %v642_v20 = vmul.f32 1.442695, %v629_v17  ;;  %v630_v21 = vsub.f32 0.0, %v567_v18  ;;  %v569_v22 = vadd.f32 %v568_v19, %v333_v57  ;;  %1290 = vpow2.f32 %v640_v16  ;;  %v621_v4 = vpop.f32.mrf.mxu1 }
 0x156   : > { %v610_v57 = vadd.f32 %v609_v35, %v337_v49  ;;  %v622_v10 = vadd.f32 %v621_v4, %v341_v50 }
 0x157   : > { %1292 = vpow2.f32 %v642_v20  ;;  %v644_v23 = vmul.f32 1.442695, %v630_v21  ;;  %v631_v24 = vsub.f32 0.0, %v569_v22  ;;  %v1045_v22 = vld [vmem:[%s1773_s4] ss:$0 sm:$0xff] }
 0x159   : > { %1294 = vpow2.f32 %v644_v23  ;;  %v646_v26 = vmul.f32 1.442695, %v631_v24 }
 0x15a   : > { %v1283_v27 = vpop.eup %1282 }
 0x15b   : > { %1296 = vpow2.f32 %v646_v26  ;;  %v648_v32 = vadd.f32 1.0, %v1283_v27 }
 0x15c   : > { %v1285_v28 = vpop.eup %1284 }
 0x15d   : > { %v649_v30 = vadd.f32 1.0, %v1285_v28 }
 0x15e   : > { %v1287_v31 = vpop.eup %1286 }
 0x15f   : > { %v650_v33 = vadd.f32 1.0, %v1287_v31  ;;  %1298 = vrcp.f32 %v649_v30 }
 0x160   : > { %v1289_v34 = vpop.eup %1288 }
 0x161   : > { %1300 = vrcp.f32 %v650_v33  ;;  %v651_v36 = vadd.f32 1.0, %v1289_v34 }
 0x162   : > { %1302 = vrcp.f32 %v648_v32  ;;  %v1291_v37 = vpop.eup %1290 }
 0x163   : > { %1304 = vrcp.f32 %v651_v36  ;;  %v652_v42 = vadd.f32 1.0, %v1291_v37 }
 0x164   : > { %v1293_v38 = vpop.eup %1292 }
 0x165   : > { %v653_v40 = vadd.f32 1.0, %v1293_v38 }
 0x166   : > { %v1295_v41 = vpop.eup %1294 }
 0x167   : > { %v654_v44 = vadd.f32 1.0, %v1295_v41  ;;  %1306 = vrcp.f32 %v653_v40 }
 0x168   : > { %v1297_v46 = vpop.eup %1296 }
 0x169   : > { %1308 = vrcp.f32 %v654_v44  ;;  %v655_v48 = vadd.f32 1.0, %v1297_v46 }
 0x16a   : > { %1310 = vrcp.f32 %v652_v42 }
 0x16b   : > { %1312 = vrcp.f32 %v655_v48 }
 0x16c   : > { %v1299_v53 = vpop.eup %1298 }
 0x16d   : > { %v665_v63 = vmul.f32 %v1299_v53, %v608_v59 }
 0x16e   : > { %v1301_v55 = vpop.eup %1300 }
 0x16f   : > { %v1303_v58 = vpop.eup %1302  ;;  %v666_v61 = vmul.f32 %v1301_v55, %v610_v57 }
 0x170   : > { %v1305_v52 = vpop.eup %1304  ;;  %v664_v1 = vmul.f32 %v1303_v58, %v606_v56 }
 0x171   : > { %v667_v0 = vmul.f32 %v1305_v52, %v612_v60 }
 0x172   : > { %v672_v3 = vpack.c.bf16 %v666_v61, %v664_v1 }
 0x173   : > { %v673_v2 = vpack.c.bf16 %v667_v0, %v665_v63 }
 0x174   : > { %v1307_v5 = vpop.eup %1306 }
 0x175   : > { %843 = vmatprep.mubr.bf16.mxu0 %v673_v2  ;;  %v669_v13 = vmul.f32 %v1307_v5, %v618_v9 }
 0x176   : > { %v1309_v54 = vpop.eup %1308  ;;  %844 = vmatmul.mubr.bf16.vlgmr.msra.gmra.mxu0 %v672_v3 }
 0x177   : > { %v1311_v8 = vpop.eup %1310  ;;  %v670_v12 = vmul.f32 %v1309_v54, %v620_v7 }
 0x178   : > { %v1313_v11 = vpop.eup %1312  ;;  %v668_v15 = vmul.f32 %v1311_v8, %v616_v6 }
 0x179   : > { %v671_v14 = vmul.f32 %v1313_v11, %v622_v10 }
 0x17a   : > { %v674_v17 = vpack.c.bf16 %v670_v12, %v668_v15 }
 0x17b   : > { %v675_v16 = vpack.c.bf16 %v671_v14, %v669_v13 }
 0x17d   : > { %851 = vmatprep.mubr.bf16.mxu1 %v675_v16 }
 0x17e   : > { %852 = vmatmul.mubr.bf16.vlgmr.msra.gmra.mxu1 %v674_v17 }
 0x236   : > { %v1104_v18 = vpop.f32.mrf.mxu0 }
 0x238   : > { %v1105_v19 = vpop.f32.mrf.mxu0 }
 0x239   : > { %v1106_v21 = vadd.f32 %v1105_v19, %v1104_v18 }
 0x23a   : > { %v1107_v20 = vpop.f32.mrf.mxu0 }
 0x23b   : > { %v846_v26 = vadd.f32 %v1106_v21, %v1045_v22 }
 0x23c   : > { %v1108_v23 = vpop.f32.mrf.mxu0 }
 0x23d   : > { %v1109_v24 = vadd.f32 %v1108_v23, %v1107_v20 }
 0x23e   : > { %v1110_v25 = vpop.f32.mrf.mxu1 }
 0x23f   : > { %v849_v27 = vadd.f32 %v1109_v24, %v1045_v22 }
 0x240   : > { %v1111_v28 = vpop.f32.mrf.mxu1 }
 0x241   : > { %v1080_v29 = vpack.c.bf16 %v849_v27, %v846_v26  ;;  %v1112_v31 = vadd.f32 %v1111_v28, %v1110_v25 }
 0x242   : > { %v1113_v30 = vpop.f32.mrf.mxu1 }
 0x243   : > { %1081 = vst [vmem:[%s284_s27] sm:$0xff] %v1080_v29   ;;  %v854_v34 = vadd.f32 %v1112_v31, %v1045_v22 }
 0x244   : > { %v1114_v32 = vpop.f32.mrf.mxu1 }
 0x245   : > { %v1115_v33 = vadd.f32 %v1114_v32, %v1113_v30 }
 0x247   : > { %v857_v35 = vadd.f32 %v1115_v33, %v1045_v22 }
 0x249   : > { %v1085_v36 = vpack.c.bf16 %v857_v35, %v854_v34 }
 0x24b   : > { %1087 = vst [vmem:[%s284_s27 + $0x8] sm:$0xff] %v1085_v36  }
 0x24c   : > { %1433 = shalt.err (!%p1430_p9)
}
 0x24d   : > { %s1434_s23 = scalar_lea.hbm %s1726_s14, 256  ;;  %s1438_s24 = scalar_lea.hbm %s1774_s5, 512 }
 0x24e   : > { %p1435_p1 = scmp.ne.s32.totalorder %s1726_s14, %s1434_s23  ;;  %p1439_p11 = scmp.lt.s32.totalorder %s1726_s14, %s1774_s5 }
 0x24f   : > { %p1440_p13 = scmp.lt.s32.totalorder %s1438_s24, %s1434_s23 }
 0x250   : > { %p1436_p8 = pnand %p1435_p1, %p1794_p6 }
 0x251   : > { %p1441_p2 = por %p1440_p13, %p1439_p11 }
 0x252   : > { %p1437_p10 = pneg %p1436_p8 }
 0x254   : > { %p1442_p4 = pnand %p1441_p2, %p1437_p10 }
 0x256   : > { %1445 = shalt.err (!%p1442_p4)
}
 0x257   : > { %s1504_s17 = smov 64   ;;  %s1505_s30 = smov 4  }
 0x258   : > { %1146 = dma.vmem_to_hbm [thread:$0]  (%p1794_p6), %s1721_s15, 256, %s1726_s14, %s881_s11, %s1504_s17, %s1504_s17, %s1505_s30  }
 0x259 PF: > { %s909_s13 = sand.u32 1, %s1480_s18   ;;  %p1795_p12 = scmp.ne.s32.totalorder %s1781_s25, 0 }
 0x25a   : > { %p1796_p0 = scmp.ge.s32.totalorder %s1492_s21, 2  ;;  %s910_s16 = scalar_lea.sflag [#allocation4], %s909_s13 }
 0x25c   : > { %p1163_p5 = pnand %p1796_p0, %p1795_p12 }
 0x25e   : > { %p1164_p3 = pneg %p1163_p5 }
 0x260   : > { %1475 = dma.done.wait (%p1164_p3), %s910_s16, 256  }
 0x261   : > { %1477 = vsyncadd (%p1164_p3), %s910_s16, 4294967040  ;;  %p20_p7 = scmp.ge.s32.totalorder %s1619_s6, 4   ;;  %s1797_s18 = smov %s1484_s19 }
 0x262   : > { %s1798_s19 = smov %s1488_s20  ;;  %s1799_s20 = smov %s1629_s10 }
 0x263   : > { %s1800_s21 = smov %s1619_s6  ;;  %22 = sbr.rel (!%p20_p7) target bundleno = 7 (0x7), region = 97 }
 0x268   :  { %915 = vsyncpa [#allocation3], 1 }
 0x269   :  { %917 = vsyncpa [#allocation3 + $0x1], 1 }
 0x26a   :  { %918 = vsyncpa [#allocation6], 1 }
 0x26b   :  { %919 = vsyncpa [#allocation9], 1 }
 0x26c   :  { %920 = vsyncpa [#allocation4], 1 }
 0x26d   :  { %922 = vsyncpa [#allocation4 + $0x1], 1 }

</bundles_post_ra>
